<compile_context>
chip_gen: v5e
topology: v5e:2x2
jax: 0.10.0
libtpu: 0.0.40
codegen_flags: <defaults>
</compile_context>

<pallas_src>
import functools

import jax
import jax.numpy as jnp
from jax import lax
from jax.experimental import pallas as pl
from jax.experimental.pallas import tpu as pltpu


LN_EPS = 1e-12


# ------------------------------ in-kernel helpers ----------------------------

def _gelu(x):
    # TODO(synk): HF BERT default is exact erf-GELU; tanh approximation used
    # here (EUP-friendly), relative differences ~1e-3.
    return 0.5 * x * (1.0 + jnp.tanh(0.7978845608028654
                                     * (x + 0.044715 * x * x * x)))


def _layernorm(x, gamma, beta, eps=LN_EPS):
    mean = jnp.mean(x, axis=-1, keepdims=True)
    var = jnp.mean(jnp.square(x - mean), axis=-1, keepdims=True)
    return (x - mean) * lax.rsqrt(var + eps) * gamma + beta


def _bf16_dot(a, b):
    # bf16 MXU operands, fp32 accumulation.
    return jnp.dot(a.astype(jnp.bfloat16), b.astype(jnp.bfloat16),
                   preferred_element_type=jnp.float32)


def _bf16_dot_tb(a, b):
    # a @ b.T without materializing the transpose (MXU handles trans_b).
    return lax.dot_general(a.astype(jnp.bfloat16), b.astype(jnp.bfloat16),
                           dimension_numbers=(((1,), (1,)), ((), ())),
                           preferred_element_type=jnp.float32)


# ------------------------------- Pallas kernels -------------------------------

def _embed_ln_kernel(x_ref, g_ref, b_ref, o_ref):
    x = x_ref[...].astype(jnp.float32)
    o_ref[...] = _layernorm(x, g_ref[...], b_ref[...]).astype(o_ref.dtype)


def _attn_block_kernel(x_ref, m_ref, qkv_w_ref, qkv_b_ref, o_w_ref, o_b_ref,
                       g_ref, beta_ref, o_ref, *, num_heads, scale):
    """Fused: QKV proj -> per-head masked softmax attn -> out proj -> res+LN."""
    x = x_ref[0].astype(jnp.float32)                     # [L, H]
    H = x.shape[-1]
    Dh = H // num_heads
    mask = m_ref[0]                                      # [1, L] additive bias

    qkv = _bf16_dot(x, qkv_w_ref[...]) + qkv_b_ref[...]  # [L, 3H]
    o_w = o_w_ref[...]                                   # [H, H]

    attn = jnp.zeros(x.shape, jnp.float32)
    for h in range(num_heads):                           # static unrolled loop
        qh = qkv[:, h * Dh:(h + 1) * Dh]
        kh = qkv[:, H + h * Dh:H + (h + 1) * Dh]
        vh = qkv[:, 2 * H + h * Dh:2 * H + (h + 1) * Dh]

        s = _bf16_dot_tb(qh, kh) * scale + mask          # [L, L]
        s = s - jnp.max(s, axis=-1, keepdims=True)
        p = jnp.exp(s)
        p = p * pl.reciprocal(jnp.sum(p, axis=-1, keepdims=True), approx=True)

        ctx = _bf16_dot(p, vh)                           # [L, Dh]
        # output projection folded per head: ctx @ o_w[h*Dh:(h+1)*Dh, :]
        attn = attn + _bf16_dot(ctx, o_w[h * Dh:(h + 1) * Dh, :])

    attn = attn + o_b_ref[...]
    o_ref[0] = _layernorm(x + attn, g_ref[...], beta_ref[...]).astype(o_ref.dtype)


def _ffn_block_kernel(x_ref, w1_ref, b1_ref, w2_ref, b2_ref, g_ref, beta_ref,
                      o_ref):
    """Fused: dense+GELU -> dense -> residual -> LayerNorm."""
    x = x_ref[...].astype(jnp.float32)
    h1 = _gelu(_bf16_dot(x, w1_ref[...]) + b1_ref[...])
    h2 = _bf16_dot(h1, w2_ref[...]) + b2_ref[...]
    o_ref[...] = _layernorm(x + h2, g_ref[...], beta_ref[...]).astype(o_ref.dtype)


def _mlm_head_kernel(x_ref, w_ref, b_ref, g_ref, beta_ref, emb_ref, dec_b_ref,
                     o_ref):
    """Fused MLM head: transform dense + GELU -> LN -> tied decoder (trans_b)."""
    x = x_ref[...].astype(jnp.float32)
    t = _gelu(_bf16_dot(x, w_ref[...]) + b_ref[...])
    t = _layernorm(t, g_ref[...], beta_ref[...])
    o_ref[...] = (_bf16_dot_tb(t, emb_ref[...]) + dec_b_ref[...]).astype(o_ref.dtype)


# ------------------------------- call wrappers --------------------------------

def _row_tile(m):
    return 8 if m % 8 == 0 else m


def embed_layernorm(x, gamma, beta):
    M, H = x.shape
    tm = _row_tile(M)
    return pl.pallas_call(
        _embed_ln_kernel,
        out_shape=jax.ShapeDtypeStruct((M, H), jnp.float32),
        grid=(M // tm,),
        in_specs=[
            pl.BlockSpec((tm, H), lambda i: (i, 0)),
            pl.BlockSpec((1, H), lambda i: (0, 0)),
            pl.BlockSpec((1, H), lambda i: (0, 0)),
        ],
        out_specs=pl.BlockSpec((tm, H), lambda i: (i, 0)),
        compiler_params=pltpu.CompilerParams(dimension_semantics=("parallel",)),
    )(x, gamma.reshape(1, H), beta.reshape(1, H))


def attention_block(x, mask_bias, lyr, num_heads):
    B, L, H = x.shape
    scale = 1.0 / float(H // num_heads) ** 0.5
    kern = functools.partial(_attn_block_kernel, num_heads=num_heads, scale=scale)
    return pl.pallas_call(
        kern,
        out_shape=jax.ShapeDtypeStruct((B, L, H), jnp.float32),
        grid=(B,),
        in_specs=[
            pl.BlockSpec((1, L, H), lambda b: (b, 0, 0)),     # hidden states
            pl.BlockSpec((1, 1, L), lambda b: (b, 0, 0)),     # additive mask bias
            pl.BlockSpec((H, 3 * H), lambda b: (0, 0)),       # fused QKV weight
            pl.BlockSpec((1, 3 * H), lambda b: (0, 0)),       # fused QKV bias
            pl.BlockSpec((H, H), lambda b: (0, 0)),           # output proj weight
            pl.BlockSpec((1, H), lambda b: (0, 0)),           # output proj bias
            pl.BlockSpec((1, H), lambda b: (0, 0)),           # LN gamma
            pl.BlockSpec((1, H), lambda b: (0, 0)),           # LN beta
        ],
        out_specs=pl.BlockSpec((1, L, H), lambda b: (b, 0, 0)),
        compiler_params=pltpu.CompilerParams(dimension_semantics=("parallel",)),
    )(x, mask_bias,
      lyr["qkv_w"], lyr["qkv_b"].reshape(1, -1),
      lyr["o_w"], lyr["o_b"].reshape(1, -1),
      lyr["attn_ln_g"].reshape(1, -1), lyr["attn_ln_b"].reshape(1, -1))


def ffn_block(x, lyr):
    M, H = x.shape
    I = lyr["ffn_w1"].shape[1]
    tm = _row_tile(M)
    cost = pl.CostEstimate(
        flops=4 * M * H * I,
        transcendentals=M * I,
        bytes_accessed=4 * (2 * M * H + 2 * H * I + M * I))
    return pl.pallas_call(
        _ffn_block_kernel,
        out_shape=jax.ShapeDtypeStruct((M, H), jnp.float32),
        grid=(M // tm,),
        in_specs=[
            pl.BlockSpec((tm, H), lambda i: (i, 0)),
            pl.BlockSpec((H, I), lambda i: (0, 0)),
            pl.BlockSpec((1, I), lambda i: (0, 0)),
            pl.BlockSpec((I, H), lambda i: (0, 0)),
            pl.BlockSpec((1, H), lambda i: (0, 0)),
            pl.BlockSpec((1, H), lambda i: (0, 0)),
            pl.BlockSpec((1, H), lambda i: (0, 0)),
        ],
        out_specs=pl.BlockSpec((tm, H), lambda i: (i, 0)),
        compiler_params=pltpu.CompilerParams(dimension_semantics=("parallel",)),
        cost_estimate=cost,
    )(x, lyr["ffn_w1"], lyr["ffn_b1"].reshape(1, -1),
      lyr["ffn_w2"], lyr["ffn_b2"].reshape(1, -1),
      lyr["ffn_ln_g"].reshape(1, -1), lyr["ffn_ln_b"].reshape(1, -1))


def mlm_head(x, params):
    M, H = x.shape
    V = params["word_emb"].shape[0]
    tm = _row_tile(M)
    cost = pl.CostEstimate(
        flops=2 * M * H * (H + V),
        transcendentals=M * H,
        bytes_accessed=4 * (M * H + H * H + V * H + M * V))
    return pl.pallas_call(
        _mlm_head_kernel,
        out_shape=jax.ShapeDtypeStruct((M, V), jnp.float32),
        grid=(M // tm,),
        in_specs=[
            pl.BlockSpec((tm, H), lambda i: (i, 0)),
            pl.BlockSpec((H, H), lambda i: (0, 0)),
            pl.BlockSpec((1, H), lambda i: (0, 0)),
            pl.BlockSpec((1, H), lambda i: (0, 0)),
            pl.BlockSpec((1, H), lambda i: (0, 0)),
            pl.BlockSpec((V, H), lambda i: (0, 0)),   # tied decoder weight (row-major)
            pl.BlockSpec((1, V), lambda i: (0, 0)),
        ],
        out_specs=pl.BlockSpec((tm, V), lambda i: (i, 0)),
        compiler_params=pltpu.CompilerParams(dimension_semantics=("parallel",)),
        cost_estimate=cost,
    )(x, params["mlm_dense_w"], params["mlm_dense_b"].reshape(1, -1),
      params["mlm_ln_g"].reshape(1, -1), params["mlm_ln_b"].reshape(1, -1),
      params["word_emb"], params["mlm_decoder_bias"].reshape(1, -1))


# -------------------------- model config / parameters --------------------------

CFG = dict(
    vocab_size=64,
    hidden=32,
    num_heads=2,
    num_layers=2,
    intermediate=64,
    max_position=8,
    type_vocab=2,
    max_length=8,
)


def init_params(key, cfg):
    # TODO(synk): real module loads pretrained HF weights; random init here.
    H, I, V = cfg["hidden"], cfg["intermediate"], cfg["vocab_size"]
    scale = 0.02

    def nrm(k, shape):
        return (scale * jax.random.normal(k, shape)).astype(jnp.float32)

    keys = iter(jax.random.split(key, 128))
    p = {
        "word_emb": nrm(next(keys), (V, H)),
        "pos_emb": nrm(next(keys), (cfg["max_position"], H)),
        "type_emb": nrm(next(keys), (cfg["type_vocab"], H)),
        "emb_ln_g": jnp.ones((H,), jnp.float32),
        "emb_ln_b": jnp.zeros((H,), jnp.float32),
        "layers": [],
        # MLM head (BertOnlyMLMHead): transform dense + LN + tied decoder + bias
        "mlm_dense_w": nrm(next(keys), (H, H)),
        "mlm_dense_b": jnp.zeros((H,), jnp.float32),
        "mlm_ln_g": jnp.ones((H,), jnp.float32),
        "mlm_ln_b": jnp.zeros((H,), jnp.float32),
        "mlm_decoder_bias": jnp.zeros((V,), jnp.float32),
    }
    for _ in range(cfg["num_layers"]):
        layer = {
            # fused QKV projection: [H, 3H] = (Wq | Wk | Wv), one MXU pass/layer
            "qkv_w": jnp.concatenate(
                [nrm(next(keys), (H, H)) for _ in range(3)], axis=1),
            "qkv_b": jnp.zeros((3 * H,), jnp.float32),
            "o_w": nrm(next(keys), (H, H)), "o_b": jnp.zeros((H,), jnp.float32),
            "attn_ln_g": jnp.ones((H,), jnp.float32),
            "attn_ln_b": jnp.zeros((H,), jnp.float32),
            "ffn_w1": nrm(next(keys), (H, I)), "ffn_b1": jnp.zeros((I,), jnp.float32),
            "ffn_w2": nrm(next(keys), (I, H)), "ffn_b2": jnp.zeros((H,), jnp.float32),
            "ffn_ln_g": jnp.ones((H,), jnp.float32),
            "ffn_ln_b": jnp.zeros((H,), jnp.float32),
        }
        p["layers"].append(layer)
    return p


# --------------------------------- forward pass --------------------------------

@functools.partial(jax.jit, static_argnames=("num_heads",))
def _bert_pair_logits(params, word, seg, mask, *, num_heads):
    B, L = word.shape
    V, H = params["word_emb"].shape

    # embeddings (gathers are plain-JAX glue, fused by XLA) + Pallas LayerNorm
    pos_ids = jnp.arange(L, dtype=jnp.int32)
    emb = (jnp.take(params["word_emb"], word, axis=0)
           + jnp.take(params["pos_emb"], pos_ids, axis=0)[None, :, :]
           + jnp.take(params["type_emb"], seg, axis=0))
    h2d = embed_layernorm(emb.reshape(B * L, H),
                          params["emb_ln_g"], params["emb_ln_b"])

    # additive key-mask bias, [B, 1, L]
    mask_bias = ((1.0 - mask.astype(jnp.float32)) * -10000.0)[:, None, :]

    h = h2d.reshape(B, L, H)
    for lyr in params["layers"]:
        h = attention_block(h, mask_bias, lyr, num_heads)            # 1 call
        h = ffn_block(h.reshape(B * L, H), lyr).reshape(B, L, H)     # 1 call

    logits = mlm_head(h.reshape(B * L, H), params)                   # 1 call
    return logits.reshape(B, L, V)


def bert_pair_sentence_encoder_forward(params, inputs, cfg):
    """Mirrors BERTPAIRSentenceEncoder.forward: returns ('', logits[B, L, V])."""
    logits = _bert_pair_logits(params, inputs["word"], inputs["seg"],
                               inputs["mask"], num_heads=cfg["num_heads"])
    return ("", logits)


# ------------------------------------- main -------------------------------------

if __name__ == "__main__":
    cfg = CFG
    key = jax.random.PRNGKey(0)
    k_par, k_word = jax.random.split(key, 2)

    params = init_params(k_par, cfg)

    B, L = 2, cfg["max_length"]
    word = jax.random.randint(k_word, (B, L), 0, cfg["vocab_size"], dtype=jnp.int32)
    seg = jnp.concatenate(
        [jnp.zeros((B, L // 2), jnp.int32), jnp.ones((B, L - L // 2), jnp.int32)],
        axis=1)
    # first sequence fully valid, second has 2 padding positions
    mask = jnp.stack([jnp.ones((L,), jnp.int32),
                      jnp.concatenate([jnp.ones((L - 2,), jnp.int32),
                                       jnp.zeros((2,), jnp.int32)])], axis=0)

    inputs = {"word": word, "seg": seg, "mask": mask}

    _, logits = bert_pair_sentence_encoder_forward(params, inputs, cfg)
    logits = jax.block_until_ready(logits)

    assert logits.shape == (B, L, cfg["vocab_size"])
    assert logits.dtype == jnp.float32
    assert bool(jnp.all(jnp.isfinite(logits)))
    print("KERNEL_OK")
</pallas_src>

<mosaic_0001>
module attributes {stable_mosaic.version = 11 : i64} {
  func.func @_embed_ln_kernel(%arg0: i32, %arg1: memref<8x32xf32, #tpu.memory_space<vmem>>, %arg2: memref<1x32xf32, #tpu.memory_space<vmem>>, %arg3: memref<1x32xf32, #tpu.memory_space<vmem>>, %arg4: memref<8x32xf32, #tpu.memory_space<vmem>>) attributes {dimension_semantics = [#tpu.dimension_semantics<parallel>], iteration_bounds = array<i64: 2>, scalar_prefetch = 0 : i64, scratch_operands = 0 : i64, tpu.core_type = #tpu.core_type<tc>, window_params = [{transform_indices = @transform_0, window_bounds = array<i64: 8, 32>}, {pipeline_mode = #tpu.pipeline_mode<synchronous>, transform_indices = @transform_1, window_bounds = array<i64: 1, 32>}, {pipeline_mode = #tpu.pipeline_mode<synchronous>, transform_indices = @transform_2, window_bounds = array<i64: 1, 32>}, {transform_indices = @transform_3, window_bounds = array<i64: 8, 32>}]} {
    %c0 = arith.constant 0 : index
    %c0_0 = arith.constant 0 : index
    %0 = vector.load %arg1[%c0, %c0_0] : memref<8x32xf32, #tpu.memory_space<vmem>>, vector<8x32xf32>
    %c0_1 = arith.constant 0 : index
    %c0_2 = arith.constant 0 : index
    %1 = vector.load %arg2[%c0_1, %c0_2] : memref<1x32xf32, #tpu.memory_space<vmem>>, vector<1x32xf32>
    %c0_3 = arith.constant 0 : index
    %c0_4 = arith.constant 0 : index
    %2 = vector.load %arg3[%c0_3, %c0_4] : memref<1x32xf32, #tpu.memory_space<vmem>>, vector<1x32xf32>
    %cst = arith.constant dense<0.000000e+00> : vector<8xf32>
    %3 = vector.multi_reduction <add>, %0, %cst [1] : vector<8x32xf32> to vector<8xf32>
    %4 = vector.shape_cast %3 : vector<8xf32> to vector<8x1xf32>
    %cst_5 = arith.constant 3.200000e+01 : f32
    %5 = vector.broadcast %cst_5 : f32 to vector<8x1xf32>
    %6 = arith.divf %4, %5 : vector<8x1xf32>
    %7 = vector.broadcast %6 : vector<8x1xf32> to vector<8x32xf32>
    %8 = arith.subf %0, %7 : vector<8x32xf32>
    %9 = arith.mulf %8, %8 : vector<8x32xf32>
    %cst_6 = arith.constant dense<0.000000e+00> : vector<8xf32>
    %10 = vector.multi_reduction <add>, %9, %cst_6 [1] : vector<8x32xf32> to vector<8xf32>
    %11 = vector.shape_cast %10 : vector<8xf32> to vector<8x1xf32>
    %cst_7 = arith.constant 3.200000e+01 : f32
    %12 = vector.broadcast %cst_7 : f32 to vector<8x1xf32>
    %13 = arith.divf %11, %12 : vector<8x1xf32>
    %14 = vector.broadcast %6 : vector<8x1xf32> to vector<8x32xf32>
    %15 = arith.subf %0, %14 : vector<8x32xf32>
    %cst_8 = arith.constant 9.99999996E-13 : f32
    %16 = vector.broadcast %cst_8 : f32 to vector<8x1xf32>
    %17 = arith.addf %13, %16 : vector<8x1xf32>
    %18 = math.rsqrt %17 : vector<8x1xf32>
    %19 = vector.broadcast %18 : vector<8x1xf32> to vector<8x32xf32>
    %20 = arith.mulf %15, %19 : vector<8x32xf32>
    %21 = vector.broadcast %1 : vector<1x32xf32> to vector<8x32xf32>
    %22 = arith.mulf %20, %21 : vector<8x32xf32>
    %23 = vector.broadcast %2 : vector<1x32xf32> to vector<8x32xf32>
    %24 = arith.addf %22, %23 : vector<8x32xf32>
    %c0_9 = arith.constant 0 : index
    %c0_10 = arith.constant 0 : index
    %25 = vector.load %arg4[%c0_9, %c0_10] : memref<8x32xf32, #tpu.memory_space<vmem>>, vector<8x32xf32>
    tpu.vector_store %arg4[%c0_9, %c0_10], %24 {strides = array<i32>} : memref<8x32xf32, #tpu.memory_space<vmem>>, vector<8x32xf32>,
    return
  }
  func.func @transform_0(%arg0: i32) -> (i32, i32) {
    %c0_i32 = arith.constant 0 : i32
    %c0_i32_0 = arith.constant 0 : i32
    return %arg0, %c0_i32 : i32, i32
  }
  func.func @transform_1(%arg0: i32) -> (i32, i32) {
    %c0_i32 = arith.constant 0 : i32
    %c0_i32_0 = arith.constant 0 : i32
    %c0_i32_1 = arith.constant 0 : i32
    return %c0_i32, %c0_i32_0 : i32, i32
  }
  func.func @transform_2(%arg0: i32) -> (i32, i32) {
    %c0_i32 = arith.constant 0 : i32
    %c0_i32_0 = arith.constant 0 : i32
    %c0_i32_1 = arith.constant 0 : i32
    return %c0_i32, %c0_i32_0 : i32, i32
  }
  func.func @transform_3(%arg0: i32) -> (i32, i32) {
    %c0_i32 = arith.constant 0 : i32
    %c0_i32_0 = arith.constant 0 : i32
    return %arg0, %c0_i32 : i32, i32
  }
}

module attributes {stable_mosaic.version = 11 : i64} {
  func.func @_ffn_block_kernel(%arg0: i32, %arg1: memref<8x32xf32, #tpu.memory_space<vmem>>, %arg2: memref<32x64xf32, #tpu.memory_space<vmem>>, %arg3: memref<1x64xf32, #tpu.memory_space<vmem>>, %arg4: memref<64x32xf32, #tpu.memory_space<vmem>>, %arg5: memref<1x32xf32, #tpu.memory_space<vmem>>, %arg6: memref<1x32xf32, #tpu.memory_space<vmem>>, %arg7: memref<1x32xf32, #tpu.memory_space<vmem>>, %arg8: memref<8x32xf32, #tpu.memory_space<vmem>>) attributes {dimension_semantics = [#tpu.dimension_semantics<parallel>], iteration_bounds = array<i64: 2>, scalar_prefetch = 0 : i64, scratch_operands = 0 : i64, tpu.core_type = #tpu.core_type<tc>, window_params = [{transform_indices = @transform_0, window_bounds = array<i64: 8, 32>}, {pipeline_mode = #tpu.pipeline_mode<synchronous>, transform_indices = @transform_1, window_bounds = array<i64: 32, 64>}, {pipeline_mode = #tpu.pipeline_mode<synchronous>, transform_indices = @transform_2, window_bounds = array<i64: 1, 64>}, {pipeline_mode = #tpu.pipeline_mode<synchronous>, transform_indices = @transform_3, window_bounds = array<i64: 64, 32>}, {pipeline_mode = #tpu.pipeline_mode<synchronous>, transform_indices = @transform_4, window_bounds = array<i64: 1, 32>}, {pipeline_mode = #tpu.pipeline_mode<synchronous>, transform_indices = @transform_5, window_bounds = array<i64: 1, 32>}, {pipeline_mode = #tpu.pipeline_mode<synchronous>, transform_indices = @transform_6, window_bounds = array<i64: 1, 32>}, {transform_indices = @transform_7, window_bounds = array<i64: 8, 32>}]} {
    %c0 = arith.constant 0 : index
    %c0_0 = arith.constant 0 : index
    %0 = vector.load %arg1[%c0, %c0_0] : memref<8x32xf32, #tpu.memory_space<vmem>>, vector<8x32xf32>
    %c0_1 = arith.constant 0 : index
    %c0_2 = arith.constant 0 : index
    %1 = vector.load %arg2[%c0_1, %c0_2] : memref<32x64xf32, #tpu.memory_space<vmem>>, vector<32x64xf32>
    %2 = arith.truncf %0 : vector<8x32xf32> to vector<8x32xbf16>
    %3 = arith.truncf %1 : vector<32x64xf32> to vector<32x64xbf16>
    %cst = arith.constant dense<0.000000e+00> : vector<8x64xf32>
    %4 = tpu.matmul %2, %3, %cst {dimension_numbers = #tpu.dot_dimension_numbers<[1], [0], [0], [1], [0, 0, 1, 1], [], []>} : vector<8x32xbf16>, vector<32x64xbf16>, vector<8x64xf32> -> vector<8x64xf32>
    %c0_3 = arith.constant 0 : index
    %c0_4 = arith.constant 0 : index
    %5 = vector.load %arg3[%c0_3, %c0_4] : memref<1x64xf32, #tpu.memory_space<vmem>>, vector<1x64xf32>
    %6 = vector.broadcast %5 : vector<1x64xf32> to vector<8x64xf32>
    %7 = arith.addf %4, %6 : vector<8x64xf32>
    %cst_5 = arith.constant 5.000000e-01 : f32
    %8 = vector.broadcast %cst_5 : f32 to vector<8x64xf32>
    %9 = arith.mulf %8, %7 : vector<8x64xf32>
    %cst_6 = arith.constant 4.471500e-02 : f32
    %10 = vector.broadcast %cst_6 : f32 to vector<8x64xf32>
    %11 = arith.mulf %10, %7 : vector<8x64xf32>
    %12 = arith.mulf %11, %7 : vector<8x64xf32>
    %13 = arith.mulf %12, %7 : vector<8x64xf32>
    %14 = arith.addf %7, %13 : vector<8x64xf32>
    %cst_7 = arith.constant 0.797884583 : f32
    %15 = vector.broadcast %cst_7 : f32 to vector<8x64xf32>
    %16 = arith.mulf %15, %14 : vector<8x64xf32>
    %17 = math.tanh %16 : vector<8x64xf32>
    %cst_8 = arith.constant 1.000000e+00 : f32
    %18 = vector.broadcast %cst_8 : f32 to vector<8x64xf32>
    %19 = arith.addf %18, %17 : vector<8x64xf32>
    %20 = arith.mulf %9, %19 : vector<8x64xf32>
    %c0_9 = arith.constant 0 : index
    %c0_10 = arith.constant 0 : index
    %21 = vector.load %arg4[%c0_9, %c0_10] : memref<64x32xf32, #tpu.memory_space<vmem>>, vector<64x32xf32>
    %22 = arith.truncf %20 : vector<8x64xf32> to vector<8x64xbf16>
    %23 = arith.truncf %21 : vector<64x32xf32> to vector<64x32xbf16>
    %cst_11 = arith.constant dense<0.000000e+00> : vector<8x32xf32>
    %24 = tpu.matmul %22, %23, %cst_11 {dimension_numbers = #tpu.dot_dimension_numbers<[1], [0], [0], [1], [0, 0, 1, 1], [], []>} : vector<8x64xbf16>, vector<64x32xbf16>, vector<8x32xf32> -> vector<8x32xf32>
    %c0_12 = arith.constant 0 : index
    %c0_13 = arith.constant 0 : index
    %25 = vector.load %arg5[%c0_12, %c0_13] : memref<1x32xf32, #tpu.memory_space<vmem>>, vector<1x32xf32>
    %26 = vector.broadcast %25 : vector<1x32xf32> to vector<8x32xf32>
    %27 = arith.addf %24, %26 : vector<8x32xf32>
    %28 = arith.addf %0, %27 : vector<8x32xf32>
    %c0_14 = arith.constant 0 : index
    %c0_15 = arith.constant 0 : index
    %29 = vector.load %arg6[%c0_14, %c0_15] : memref<1x32xf32, #tpu.memory_space<vmem>>, vector<1x32xf32>
    %c0_16 = arith.constant 0 : index
    %c0_17 = arith.constant 0 : index
    %30 = vector.load %arg7[%c0_16, %c0_17] : memref<1x32xf32, #tpu.memory_space<vmem>>, vector<1x32xf32>
    %cst_18 = arith.constant dense<0.000000e+00> : vector<8xf32>
    %31 = vector.multi_reduction <add>, %28, %cst_18 [1] : vector<8x32xf32> to vector<8xf32>
    %32 = vector.shape_cast %31 : vector<8xf32> to vector<8x1xf32>
    %cst_19 = arith.constant 3.200000e+01 : f32
    %33 = vector.broadcast %cst_19 : f32 to vector<8x1xf32>
    %34 = arith.divf %32, %33 : vector<8x1xf32>
    %35 = vector.broadcast %34 : vector<8x1xf32> to vector<8x32xf32>
    %36 = arith.subf %28, %35 : vector<8x32xf32>
    %37 = arith.mulf %36, %36 : vector<8x32xf32>
    %cst_20 = arith.constant dense<0.000000e+00> : vector<8xf32>
    %38 = vector.multi_reduction <add>, %37, %cst_20 [1] : vector<8x32xf32> to vector<8xf32>
    %39 = vector.shape_cast %38 : vector<8xf32> to vector<8x1xf32>
    %cst_21 = arith.constant 3.200000e+01 : f32
    %40 = vector.broadcast %cst_21 : f32 to vector<8x1xf32>
    %41 = arith.divf %39, %40 : vector<8x1xf32>
    %42 = vector.broadcast %34 : vector<8x1xf32> to vector<8x32xf32>
    %43 = arith.subf %28, %42 : vector<8x32xf32>
    %cst_22 = arith.constant 9.99999996E-13 : f32
    %44 = vector.broadcast %cst_22 : f32 to vector<8x1xf32>
    %45 = arith.addf %41, %44 : vector<8x1xf32>
    %46 = math.rsqrt %45 : vector<8x1xf32>
    %47 = vector.broadcast %46 : vector<8x1xf32> to vector<8x32xf32>
    %48 = arith.mulf %43, %47 : vector<8x32xf32>
    %49 = vector.broadcast %29 : vector<1x32xf32> to vector<8x32xf32>
    %50 = arith.mulf %48, %49 : vector<8x32xf32>
    %51 = vector.broadcast %30 : vector<1x32xf32> to vector<8x32xf32>
    %52 = arith.addf %50, %51 : vector<8x32xf32>
    %c0_23 = arith.constant 0 : index
    %c0_24 = arith.constant 0 : index
    %53 = vector.load %arg8[%c0_23, %c0_24] : memref<8x32xf32, #tpu.memory_space<vmem>>, vector<8x32xf32>
    tpu.vector_store %arg8[%c0_23, %c0_24], %52 {strides = array<i32>} : memref<8x32xf32, #tpu.memory_space<vmem>>, vector<8x32xf32>,
    return
  }
  func.func @transform_0(%arg0: i32) -> (i32, i32) {
    %c0_i32 = arith.constant 0 : i32
    %c0_i32_0 = arith.constant 0 : i32
    return %arg0, %c0_i32 : i32, i32
  }
  func.func @transform_1(%arg0: i32) -> (i32, i32) {
    %c0_i32 = arith.constant 0 : i32
    %c0_i32_0 = arith.constant 0 : i32
    %c0_i32_1 = arith.constant 0 : i32
    return %c0_i32, %c0_i32_0 : i32, i32
  }
  func.func @transform_2(%arg0: i32) -> (i32, i32) {
    %c0_i32 = arith.constant 0 : i32
    %c0_i32_0 = arith.constant 0 : i32
    %c0_i32_1 = arith.constant 0 : i32
    return %c0_i32, %c0_i32_0 : i32, i32
  }
  func.func @transform_3(%arg0: i32) -> (i32, i32) {
    %c0_i32 = arith.constant 0 : i32
    %c0_i32_0 = arith.constant 0 : i32
    %c0_i32_1 = arith.constant 0 : i32
    return %c0_i32, %c0_i32_0 : i32, i32
  }
  func.func @transform_4(%arg0: i32) -> (i32, i32) {
    %c0_i32 = arith.constant 0 : i32
    %c0_i32_0 = arith.constant 0 : i32
    %c0_i32_1 = arith.constant 0 : i32
    return %c0_i32, %c0_i32_0 : i32, i32
  }
  func.func @transform_5(%arg0: i32) -> (i32, i32) {
    %c0_i32 = arith.constant 0 : i32
    %c0_i32_0 = arith.constant 0 : i32
    %c0_i32_1 = arith.constant 0 : i32
    return %c0_i32, %c0_i32_0 : i32, i32
  }
  func.func @transform_6(%arg0: i32) -> (i32, i32) {
    %c0_i32 = arith.constant 0 : i32
    %c0_i32_0 = arith.constant 0 : i32
    %c0_i32_1 = arith.constant 0 : i32
    return %c0_i32, %c0_i32_0 : i32, i32
  }
  func.func @transform_7(%arg0: i32) -> (i32, i32) {
    %c0_i32 = arith.constant 0 : i32
    %c0_i32_0 = arith.constant 0 : i32
    return %arg0, %c0_i32 : i32, i32
  }
}

module attributes {stable_mosaic.version = 11 : i64} {
  func.func @_mlm_head_kernel(%arg0: i32, %arg1: memref<8x32xf32, #tpu.memory_space<vmem>>, %arg2: memref<32x32xf32, #tpu.memory_space<vmem>>, %arg3: memref<1x32xf32, #tpu.memory_space<vmem>>, %arg4: memref<1x32xf32, #tpu.memory_space<vmem>>, %arg5: memref<1x32xf32, #tpu.memory_space<vmem>>, %arg6: memref<64x32xf32, #tpu.memory_space<vmem>>, %arg7: memref<1x64xf32, #tpu.memory_space<vmem>>, %arg8: memref<8x64xf32, #tpu.memory_space<vmem>>) attributes {dimension_semantics = [#tpu.dimension_semantics<parallel>], iteration_bounds = array<i64: 2>, scalar_prefetch = 0 : i64, scratch_operands = 0 : i64, tpu.core_type = #tpu.core_type<tc>, window_params = [{transform_indices = @transform_0, window_bounds = array<i64: 8, 32>}, {pipeline_mode = #tpu.pipeline_mode<synchronous>, transform_indices = @transform_1, window_bounds = array<i64: 32, 32>}, {pipeline_mode = #tpu.pipeline_mode<synchronous>, transform_indices = @transform_2, window_bounds = array<i64: 1, 32>}, {pipeline_mode = #tpu.pipeline_mode<synchronous>, transform_indices = @transform_3, window_bounds = array<i64: 1, 32>}, {pipeline_mode = #tpu.pipeline_mode<synchronous>, transform_indices = @transform_4, window_bounds = array<i64: 1, 32>}, {pipeline_mode = #tpu.pipeline_mode<synchronous>, transform_indices = @transform_5, window_bounds = array<i64: 64, 32>}, {pipeline_mode = #tpu.pipeline_mode<synchronous>, transform_indices = @transform_6, window_bounds = array<i64: 1, 64>}, {transform_indices = @transform_7, window_bounds = array<i64: 8, 64>}]} {
    %c0 = arith.constant 0 : index
    %c0_0 = arith.constant 0 : index
    %0 = vector.load %arg1[%c0, %c0_0] : memref<8x32xf32, #tpu.memory_space<vmem>>, vector<8x32xf32>
    %c0_1 = arith.constant 0 : index
    %c0_2 = arith.constant 0 : index
    %1 = vector.load %arg2[%c0_1, %c0_2] : memref<32x32xf32, #tpu.memory_space<vmem>>, vector<32x32xf32>
    %2 = arith.truncf %0 : vector<8x32xf32> to vector<8x32xbf16>
    %3 = arith.truncf %1 : vector<32x32xf32> to vector<32x32xbf16>
    %cst = arith.constant dense<0.000000e+00> : vector<8x32xf32>
    %4 = tpu.matmul %2, %3, %cst {dimension_numbers = #tpu.dot_dimension_numbers<[1], [0], [0], [1], [0, 0, 1, 1], [], []>} : vector<8x32xbf16>, vector<32x32xbf16>, vector<8x32xf32> -> vector<8x32xf32>
    %c0_3 = arith.constant 0 : index
    %c0_4 = arith.constant 0 : index
    %5 = vector.load %arg3[%c0_3, %c0_4] : memref<1x32xf32, #tpu.memory_space<vmem>>, vector<1x32xf32>
    %6 = vector.broadcast %5 : vector<1x32xf32> to vector<8x32xf32>
    %7 = arith.addf %4, %6 : vector<8x32xf32>
    %cst_5 = arith.constant 5.000000e-01 : f32
    %8 = vector.broadcast %cst_5 : f32 to vector<8x32xf32>
    %9 = arith.mulf %8, %7 : vector<8x32xf32>
    %cst_6 = arith.constant 4.471500e-02 : f32
    %10 = vector.broadcast %cst_6 : f32 to vector<8x32xf32>
    %11 = arith.mulf %10, %7 : vector<8x32xf32>
    %12 = arith.mulf %11, %7 : vector<8x32xf32>
    %13 = arith.mulf %12, %7 : vector<8x32xf32>
    %14 = arith.addf %7, %13 : vector<8x32xf32>
    %cst_7 = arith.constant 0.797884583 : f32
    %15 = vector.broadcast %cst_7 : f32 to vector<8x32xf32>
    %16 = arith.mulf %15, %14 : vector<8x32xf32>
    %17 = math.tanh %16 : vector<8x32xf32>
    %cst_8 = arith.constant 1.000000e+00 : f32
    %18 = vector.broadcast %cst_8 : f32 to vector<8x32xf32>
    %19 = arith.addf %18, %17 : vector<8x32xf32>
    %20 = arith.mulf %9, %19 : vector<8x32xf32>
    %c0_9 = arith.constant 0 : index
    %c0_10 = arith.constant 0 : index
    %21 = vector.load %arg4[%c0_9, %c0_10] : memref<1x32xf32, #tpu.memory_space<vmem>>, vector<1x32xf32>
    %c0_11 = arith.constant 0 : index
    %c0_12 = arith.constant 0 : index
    %22 = vector.load %arg5[%c0_11, %c0_12] : memref<1x32xf32, #tpu.memory_space<vmem>>, vector<1x32xf32>
    %cst_13 = arith.constant dense<0.000000e+00> : vector<8xf32>
    %23 = vector.multi_reduction <add>, %20, %cst_13 [1] : vector<8x32xf32> to vector<8xf32>
    %24 = vector.shape_cast %23 : vector<8xf32> to vector<8x1xf32>
    %cst_14 = arith.constant 3.200000e+01 : f32
    %25 = vector.broadcast %cst_14 : f32 to vector<8x1xf32>
    %26 = arith.divf %24, %25 : vector<8x1xf32>
    %27 = vector.broadcast %26 : vector<8x1xf32> to vector<8x32xf32>
    %28 = arith.subf %20, %27 : vector<8x32xf32>
    %29 = arith.mulf %28, %28 : vector<8x32xf32>
    %cst_15 = arith.constant dense<0.000000e+00> : vector<8xf32>
    %30 = vector.multi_reduction <add>, %29, %cst_15 [1] : vector<8x32xf32> to vector<8xf32>
    %31 = vector.shape_cast %30 : vector<8xf32> to vector<8x1xf32>
    %cst_16 = arith.constant 3.200000e+01 : f32
    %32 = vector.broadcast %cst_16 : f32 to vector<8x1xf32>
    %33 = arith.divf %31, %32 : vector<8x1xf32>
    %34 = vector.broadcast %26 : vector<8x1xf32> to vector<8x32xf32>
    %35 = arith.subf %20, %34 : vector<8x32xf32>
    %cst_17 = arith.constant 9.99999996E-13 : f32
    %36 = vector.broadcast %cst_17 : f32 to vector<8x1xf32>
    %37 = arith.addf %33, %36 : vector<8x1xf32>
    %38 = math.rsqrt %37 : vector<8x1xf32>
    %39 = vector.broadcast %38 : vector<8x1xf32> to vector<8x32xf32>
    %40 = arith.mulf %35, %39 : vector<8x32xf32>
    %41 = vector.broadcast %21 : vector<1x32xf32> to vector<8x32xf32>
    %42 = arith.mulf %40, %41 : vector<8x32xf32>
    %43 = vector.broadcast %22 : vector<1x32xf32> to vector<8x32xf32>
    %44 = arith.addf %42, %43 : vector<8x32xf32>
    %c0_18 = arith.constant 0 : index
    %c0_19 = arith.constant 0 : index
    %45 = vector.load %arg6[%c0_18, %c0_19] : memref<64x32xf32, #tpu.memory_space<vmem>>, vector<64x32xf32>
    %46 = arith.truncf %44 : vector<8x32xf32> to vector<8x32xbf16>
    %47 = arith.truncf %45 : vector<64x32xf32> to vector<64x32xbf16>
    %cst_20 = arith.constant dense<0.000000e+00> : vector<8x64xf32>
    %48 = tpu.matmul %46, %47, %cst_20 {dimension_numbers = #tpu.dot_dimension_numbers<[1], [1], [0], [0], [0, 0, 1, 0], [], []>} : vector<8x32xbf16>, vector<64x32xbf16>, vector<8x64xf32> -> vector<8x64xf32>
    %c0_21 = arith.constant 0 : index
    %c0_22 = arith.constant 0 : index
    %49 = vector.load %arg7[%c0_21, %c0_22] : memref<1x64xf32, #tpu.memory_space<vmem>>, vector<1x64xf32>
    %50 = vector.broadcast %49 : vector<1x64xf32> to vector<8x64xf32>
    %51 = arith.addf %48, %50 : vector<8x64xf32>
    %c0_23 = arith.constant 0 : index
    %c0_24 = arith.constant 0 : index
    %52 = vector.load %arg8[%c0_23, %c0_24] : memref<8x64xf32, #tpu.memory_space<vmem>>, vector<8x64xf32>
    tpu.vector_store %arg8[%c0_23, %c0_24], %51 {strides = array<i32>} : memref<8x64xf32, #tpu.memory_space<vmem>>, vector<8x64xf32>,
    return
  }
  func.func @transform_0(%arg0: i32) -> (i32, i32) {
    %c0_i32 = arith.constant 0 : i32
    %c0_i32_0 = arith.constant 0 : i32
    return %arg0, %c0_i32 : i32, i32
  }
  func.func @transform_1(%arg0: i32) -> (i32, i32) {
    %c0_i32 = arith.constant 0 : i32
    %c0_i32_0 = arith.constant 0 : i32
    %c0_i32_1 = arith.constant 0 : i32
    return %c0_i32, %c0_i32_0 : i32, i32
  }
  func.func @transform_2(%arg0: i32) -> (i32, i32) {
    %c0_i32 = arith.constant 0 : i32
    %c0_i32_0 = arith.constant 0 : i32
    %c0_i32_1 = arith.constant 0 : i32
    return %c0_i32, %c0_i32_0 : i32, i32
  }
  func.func @transform_3(%arg0: i32) -> (i32, i32) {
    %c0_i32 = arith.constant 0 : i32
    %c0_i32_0 = arith.constant 0 : i32
    %c0_i32_1 = arith.constant 0 : i32
    return %c0_i32, %c0_i32_0 : i32, i32
  }
  func.func @transform_4(%arg0: i32) -> (i32, i32) {
    %c0_i32 = arith.constant 0 : i32
    %c0_i32_0 = arith.constant 0 : i32
    %c0_i32_1 = arith.constant 0 : i32
    return %c0_i32, %c0_i32_0 : i32, i32
  }
  func.func @transform_5(%arg0: i32) -> (i32, i32) {
    %c0_i32 = arith.constant 0 : i32
    %c0_i32_0 = arith.constant 0 : i32
    %c0_i32_1 = arith.constant 0 : i32
    return %c0_i32, %c0_i32_0 : i32, i32
  }
  func.func @transform_6(%arg0: i32) -> (i32, i32) {
    %c0_i32 = arith.constant 0 : i32
    %c0_i32_0 = arith.constant 0 : i32
    %c0_i32_1 = arith.constant 0 : i32
    return %c0_i32, %c0_i32_0 : i32, i32
  }
  func.func @transform_7(%arg0: i32) -> (i32, i32) {
    %c0_i32 = arith.constant 0 : i32
    %c0_i32_0 = arith.constant 0 : i32
    return %arg0, %c0_i32 : i32, i32
  }
}

module attributes {stable_mosaic.version = 11 : i64} {
  func.func @_attn_block_kernel(%arg0: i32, %arg1: memref<1x8x32xf32, #tpu.memory_space<vmem>>, %arg2: memref<1x1x8xf32, #tpu.memory_space<vmem>>, %arg3: memref<32x96xf32, #tpu.memory_space<vmem>>, %arg4: memref<1x96xf32, #tpu.memory_space<vmem>>, %arg5: memref<32x32xf32, #tpu.memory_space<vmem>>, %arg6: memref<1x32xf32, #tpu.memory_space<vmem>>, %arg7: memref<1x32xf32, #tpu.memory_space<vmem>>, %arg8: memref<1x32xf32, #tpu.memory_space<vmem>>, %arg9: memref<1x8x32xf32, #tpu.memory_space<vmem>>) attributes {dimension_semantics = [#tpu.dimension_semantics<parallel>], iteration_bounds = array<i64: 2>, scalar_prefetch = 0 : i64, scratch_operands = 0 : i64, tpu.core_type = #tpu.core_type<tc>, window_params = [{transform_indices = @transform_0, window_bounds = array<i64: 1, 8, 32>}, {transform_indices = @transform_1, window_bounds = array<i64: 1, 1, 8>}, {pipeline_mode = #tpu.pipeline_mode<synchronous>, transform_indices = @transform_2, window_bounds = array<i64: 32, 96>}, {pipeline_mode = #tpu.pipeline_mode<synchronous>, transform_indices = @transform_3, window_bounds = array<i64: 1, 96>}, {pipeline_mode = #tpu.pipeline_mode<synchronous>, transform_indices = @transform_4, window_bounds = array<i64: 32, 32>}, {pipeline_mode = #tpu.pipeline_mode<synchronous>, transform_indices = @transform_5, window_bounds = array<i64: 1, 32>}, {pipeline_mode = #tpu.pipeline_mode<synchronous>, transform_indices = @transform_6, window_bounds = array<i64: 1, 32>}, {pipeline_mode = #tpu.pipeline_mode<synchronous>, transform_indices = @transform_7, window_bounds = array<i64: 1, 32>}, {transform_indices = @transform_8, window_bounds = array<i64: 1, 8, 32>}]} {
    %c0 = arith.constant 0 : index
    %c0_0 = arith.constant 0 : index
    %c0_1 = arith.constant 0 : index
    %0 = vector.load %arg1[%c0, %c0_0, %c0_1] : memref<1x8x32xf32, #tpu.memory_space<vmem>>, vector<1x8x32xf32>
    %1 = vector.shape_cast %0 : vector<1x8x32xf32> to vector<8x32xf32>
    %c0_2 = arith.constant 0 : index
    %c0_3 = arith.constant 0 : index
    %c0_4 = arith.constant 0 : index
    %2 = vector.load %arg2[%c0_2, %c0_3, %c0_4] : memref<1x1x8xf32, #tpu.memory_space<vmem>>, vector<1x1x8xf32>
    %3 = vector.shape_cast %2 : vector<1x1x8xf32> to vector<1x8xf32>
    %c0_5 = arith.constant 0 : index
    %c0_6 = arith.constant 0 : index
    %4 = vector.load %arg3[%c0_5, %c0_6] : memref<32x96xf32, #tpu.memory_space<vmem>>, vector<32x96xf32>
    %5 = arith.truncf %1 : vector<8x32xf32> to vector<8x32xbf16>
    %6 = arith.truncf %4 : vector<32x96xf32> to vector<32x96xbf16>
    %cst = arith.constant dense<0.000000e+00> : vector<8x96xf32>
    %7 = tpu.matmul %5, %6, %cst {dimension_numbers = #tpu.dot_dimension_numbers<[1], [0], [0], [1], [0, 0, 1, 1], [], []>} : vector<8x32xbf16>, vector<32x96xbf16>, vector<8x96xf32> -> vector<8x96xf32>
    %c0_7 = arith.constant 0 : index
    %c0_8 = arith.constant 0 : index
    %8 = vector.load %arg4[%c0_7, %c0_8] : memref<1x96xf32, #tpu.memory_space<vmem>>, vector<1x96xf32>
    %9 = vector.broadcast %8 : vector<1x96xf32> to vector<8x96xf32>
    %10 = arith.addf %7, %9 : vector<8x96xf32>
    %c0_9 = arith.constant 0 : index
    %c0_10 = arith.constant 0 : index
    %11 = vector.load %arg5[%c0_9, %c0_10] : memref<32x32xf32, #tpu.memory_space<vmem>>, vector<32x32xf32>
    %cst_11 = arith.constant 0.000000e+00 : f32
    %12 = vector.broadcast %cst_11 : f32 to vector<8x32xf32>
    %13 = vector.extract_strided_slice %10 {offsets = [0, 0], sizes = [8, 16], strides = [1, 1]} : vector<8x96xf32> to vector<8x16xf32>
    %14 = vector.extract_strided_slice %10 {offsets = [0, 32], sizes = [8, 16], strides = [1, 1]} : vector<8x96xf32> to vector<8x16xf32>
    %15 = vector.extract_strided_slice %10 {offsets = [0, 64], sizes = [8, 16], strides = [1, 1]} : vector<8x96xf32> to vector<8x16xf32>
    %16 = arith.truncf %13 : vector<8x16xf32> to vector<8x16xbf16>
    %17 = arith.truncf %14 : vector<8x16xf32> to vector<8x16xbf16>
    %cst_12 = arith.constant dense<0.000000e+00> : vector<8x8xf32>
    %18 = tpu.matmul %16, %17, %cst_12 {dimension_numbers = #tpu.dot_dimension_numbers<[1], [1], [0], [0], [0, 0, 1, 0], [], []>} : vector<8x16xbf16>, vector<8x16xbf16>, vector<8x8xf32> -> vector<8x8xf32>
    %cst_13 = arith.constant 2.500000e-01 : f32
    %19 = vector.broadcast %cst_13 : f32 to vector<8x8xf32>
    %20 = arith.mulf %18, %19 : vector<8x8xf32>
    %21 = vector.broadcast %3 : vector<1x8xf32> to vector<8x8xf32>
    %22 = arith.addf %20, %21 : vector<8x8xf32>
    %cst_14 = arith.constant dense<0xFF800000> : vector<8xf32>
    %23 = vector.multi_reduction <maximumf>, %22, %cst_14 [1] : vector<8x8xf32> to vector<8xf32>
    %24 = vector.shape_cast %23 : vector<8xf32> to vector<8x1xf32>
    %25 = vector.broadcast %24 : vector<8x1xf32> to vector<8x8xf32>
    %26 = arith.subf %22, %25 : vector<8x8xf32>
    %27 = math.exp %26 : vector<8x8xf32>
    %cst_15 = arith.constant dense<0.000000e+00> : vector<8xf32>
    %28 = vector.multi_reduction <add>, %27, %cst_15 [1] : vector<8x8xf32> to vector<8xf32>
    %29 = vector.shape_cast %28 : vector<8xf32> to vector<8x1xf32>
    %30 = tpu.reciprocal %29 {approx = true} : vector<8x1xf32> -> vector<8x1xf32>
    %31 = vector.broadcast %30 : vector<8x1xf32> to vector<8x8xf32>
    %32 = arith.mulf %27, %31 : vector<8x8xf32>
    %33 = arith.truncf %32 : vector<8x8xf32> to vector<8x8xbf16>
    %34 = arith.truncf %15 : vector<8x16xf32> to vector<8x16xbf16>
    %cst_16 = arith.constant dense<0.000000e+00> : vector<8x16xf32>
    %35 = tpu.matmul %33, %34, %cst_16 {dimension_numbers = #tpu.dot_dimension_numbers<[1], [0], [0], [1], [0, 0, 1, 1], [], []>} : vector<8x8xbf16>, vector<8x16xbf16>, vector<8x16xf32> -> vector<8x16xf32>
    %36 = vector.extract_strided_slice %11 {offsets = [0, 0], sizes = [16, 32], strides = [1, 1]} : vector<32x32xf32> to vector<16x32xf32>
    %37 = arith.truncf %35 : vector<8x16xf32> to vector<8x16xbf16>
    %38 = arith.truncf %36 : vector<16x32xf32> to vector<16x32xbf16>
    %cst_17 = arith.constant dense<0.000000e+00> : vector<8x32xf32>
    %39 = tpu.matmul %37, %38, %cst_17 {dimension_numbers = #tpu.dot_dimension_numbers<[1], [0], [0], [1], [0, 0, 1, 1], [], []>} : vector<8x16xbf16>, vector<16x32xbf16>, vector<8x32xf32> -> vector<8x32xf32>
    %40 = arith.addf %12, %39 : vector<8x32xf32>
    %41 = vector.extract_strided_slice %10 {offsets = [0, 16], sizes = [8, 16], strides = [1, 1]} : vector<8x96xf32> to vector<8x16xf32>
    %42 = vector.extract_strided_slice %10 {offsets = [0, 48], sizes = [8, 16], strides = [1, 1]} : vector<8x96xf32> to vector<8x16xf32>
    %43 = vector.extract_strided_slice %10 {offsets = [0, 80], sizes = [8, 16], strides = [1, 1]} : vector<8x96xf32> to vector<8x16xf32>
    %44 = arith.truncf %41 : vector<8x16xf32> to vector<8x16xbf16>
    %45 = arith.truncf %42 : vector<8x16xf32> to vector<8x16xbf16>
    %cst_18 = arith.constant dense<0.000000e+00> : vector<8x8xf32>
    %46 = tpu.matmul %44, %45, %cst_18 {dimension_numbers = #tpu.dot_dimension_numbers<[1], [1], [0], [0], [0, 0, 1, 0], [], []>} : vector<8x16xbf16>, vector<8x16xbf16>, vector<8x8xf32> -> vector<8x8xf32>
    %cst_19 = arith.constant 2.500000e-01 : f32
    %47 = vector.broadcast %cst_19 : f32 to vector<8x8xf32>
    %48 = arith.mulf %46, %47 : vector<8x8xf32>
    %49 = vector.broadcast %3 : vector<1x8xf32> to vector<8x8xf32>
    %50 = arith.addf %48, %49 : vector<8x8xf32>
    %cst_20 = arith.constant dense<0xFF800000> : vector<8xf32>
    %51 = vector.multi_reduction <maximumf>, %50, %cst_20 [1] : vector<8x8xf32> to vector<8xf32>
    %52 = vector.shape_cast %51 : vector<8xf32> to vector<8x1xf32>
    %53 = vector.broadcast %52 : vector<8x1xf32> to vector<8x8xf32>
    %54 = arith.subf %50, %53 : vector<8x8xf32>
    %55 = math.exp %54 : vector<8x8xf32>
    %cst_21 = arith.constant dense<0.000000e+00> : vector<8xf32>
    %56 = vector.multi_reduction <add>, %55, %cst_21 [1] : vector<8x8xf32> to vector<8xf32>
    %57 = vector.shape_cast %56 : vector<8xf32> to vector<8x1xf32>
    %58 = tpu.reciprocal %57 {approx = true} : vector<8x1xf32> -> vector<8x1xf32>
    %59 = vector.broadcast %58 : vector<8x1xf32> to vector<8x8xf32>
    %60 = arith.mulf %55, %59 : vector<8x8xf32>
    %61 = arith.truncf %60 : vector<8x8xf32> to vector<8x8xbf16>
    %62 = arith.truncf %43 : vector<8x16xf32> to vector<8x16xbf16>
    %cst_22 = arith.constant dense<0.000000e+00> : vector<8x16xf32>
    %63 = tpu.matmul %61, %62, %cst_22 {dimension_numbers = #tpu.dot_dimension_numbers<[1], [0], [0], [1], [0, 0, 1, 1], [], []>} : vector<8x8xbf16>, vector<8x16xbf16>, vector<8x16xf32> -> vector<8x16xf32>
    %64 = vector.extract_strided_slice %11 {offsets = [16, 0], sizes = [16, 32], strides = [1, 1]} : vector<32x32xf32> to vector<16x32xf32>
    %65 = arith.truncf %63 : vector<8x16xf32> to vector<8x16xbf16>
    %66 = arith.truncf %64 : vector<16x32xf32> to vector<16x32xbf16>
    %cst_23 = arith.constant dense<0.000000e+00> : vector<8x32xf32>
    %67 = tpu.matmul %65, %66, %cst_23 {dimension_numbers = #tpu.dot_dimension_numbers<[1], [0], [0], [1], [0, 0, 1, 1], [], []>} : vector<8x16xbf16>, vector<16x32xbf16>, vector<8x32xf32> -> vector<8x32xf32>
    %68 = arith.addf %40, %67 : vector<8x32xf32>
    %c0_24 = arith.constant 0 : index
    %c0_25 = arith.constant 0 : index
    %69 = vector.load %arg6[%c0_24, %c0_25] : memref<1x32xf32, #tpu.memory_space<vmem>>, vector<1x32xf32>
    %70 = vector.broadcast %69 : vector<1x32xf32> to vector<8x32xf32>
    %71 = arith.addf %68, %70 : vector<8x32xf32>
    %72 = arith.addf %1, %71 : vector<8x32xf32>
    %c0_26 = arith.constant 0 : index
    %c0_27 = arith.constant 0 : index
    %73 = vector.load %arg7[%c0_26, %c0_27] : memref<1x32xf32, #tpu.memory_space<vmem>>, vector<1x32xf32>
    %c0_28 = arith.constant 0 : index
    %c0_29 = arith.constant 0 : index
    %74 = vector.load %arg8[%c0_28, %c0_29] : memref<1x32xf32, #tpu.memory_space<vmem>>, vector<1x32xf32>
    %cst_30 = arith.constant dense<0.000000e+00> : vector<8xf32>
    %75 = vector.multi_reduction <add>, %72, %cst_30 [1] : vector<8x32xf32> to vector<8xf32>
    %76 = vector.shape_cast %75 : vector<8xf32> to vector<8x1xf32>
    %cst_31 = arith.constant 3.200000e+01 : f32
    %77 = vector.broadcast %cst_31 : f32 to vector<8x1xf32>
    %78 = arith.divf %76, %77 : vector<8x1xf32>
    %79 = vector.broadcast %78 : vector<8x1xf32> to vector<8x32xf32>
    %80 = arith.subf %72, %79 : vector<8x32xf32>
    %81 = arith.mulf %80, %80 : vector<8x32xf32>
    %cst_32 = arith.constant dense<0.000000e+00> : vector<8xf32>
    %82 = vector.multi_reduction <add>, %81, %cst_32 [1] : vector<8x32xf32> to vector<8xf32>
    %83 = vector.shape_cast %82 : vector<8xf32> to vector<8x1xf32>
    %cst_33 = arith.constant 3.200000e+01 : f32
    %84 = vector.broadcast %cst_33 : f32 to vector<8x1xf32>
    %85 = arith.divf %83, %84 : vector<8x1xf32>
    %86 = vector.broadcast %78 : vector<8x1xf32> to vector<8x32xf32>
    %87 = arith.subf %72, %86 : vector<8x32xf32>
    %cst_34 = arith.constant 9.99999996E-13 : f32
    %88 = vector.broadcast %cst_34 : f32 to vector<8x1xf32>
    %89 = arith.addf %85, %88 : vector<8x1xf32>
    %90 = math.rsqrt %89 : vector<8x1xf32>
    %91 = vector.broadcast %90 : vector<8x1xf32> to vector<8x32xf32>
    %92 = arith.mulf %87, %91 : vector<8x32xf32>
    %93 = vector.broadcast %73 : vector<1x32xf32> to vector<8x32xf32>
    %94 = arith.mulf %92, %93 : vector<8x32xf32>
    %95 = vector.broadcast %74 : vector<1x32xf32> to vector<8x32xf32>
    %96 = arith.addf %94, %95 : vector<8x32xf32>
    %c0_35 = arith.constant 0 : index
    %c0_36 = arith.constant 0 : index
    %c0_37 = arith.constant 0 : index
    %97 = vector.load %arg9[%c0_35, %c0_36, %c0_37] : memref<1x8x32xf32, #tpu.memory_space<vmem>>, vector<1x8x32xf32>
    %98 = vector.shape_cast %97 : vector<1x8x32xf32> to vector<8x32xf32>
    %99 = vector.shape_cast %96 : vector<8x32xf32> to vector<1x8x32xf32>
    tpu.vector_store %arg9[%c0_35, %c0_36, %c0_37], %99 {strides = array<i32>} : memref<1x8x32xf32, #tpu.memory_space<vmem>>, vector<1x8x32xf32>,
    return
  }
  func.func @transform_0(%arg0: i32) -> (i32, i32, i32) {
    %c0_i32 = arith.constant 0 : i32
    %c0_i32_0 = arith.constant 0 : i32
    %c0_i32_1 = arith.constant 0 : i32
    return %arg0, %c0_i32, %c0_i32_0 : i32, i32, i32
  }
  func.func @transform_1(%arg0: i32) -> (i32, i32, i32) {
    %c0_i32 = arith.constant 0 : i32
    %c0_i32_0 = arith.constant 0 : i32
    %c0_i32_1 = arith.constant 0 : i32
    return %arg0, %c0_i32, %c0_i32_0 : i32, i32, i32
  }
  func.func @transform_2(%arg0: i32) -> (i32, i32) {
    %c0_i32 = arith.constant 0 : i32
    %c0_i32_0 = arith.constant 0 : i32
    %c0_i32_1 = arith.constant 0 : i32
    return %c0_i32, %c0_i32_0 : i32, i32
  }
  func.func @transform_3(%arg0: i32) -> (i32, i32) {
    %c0_i32 = arith.constant 0 : i32
    %c0_i32_0 = arith.constant 0 : i32
    %c0_i32_1 = arith.constant 0 : i32
    return %c0_i32, %c0_i32_0 : i32, i32
  }
  func.func @transform_4(%arg0: i32) -> (i32, i32) {
    %c0_i32 = arith.constant 0 : i32
    %c0_i32_0 = arith.constant 0 : i32
    %c0_i32_1 = arith.constant 0 : i32
    return %c0_i32, %c0_i32_0 : i32, i32
  }
  func.func @transform_5(%arg0: i32) -> (i32, i32) {
    %c0_i32 = arith.constant 0 : i32
    %c0_i32_0 = arith.constant 0 : i32
    %c0_i32_1 = arith.constant 0 : i32
    return %c0_i32, %c0_i32_0 : i32, i32
  }
  func.func @transform_6(%arg0: i32) -> (i32, i32) {
    %c0_i32 = arith.constant 0 : i32
    %c0_i32_0 = arith.constant 0 : i32
    %c0_i32_1 = arith.constant 0 : i32
    return %c0_i32, %c0_i32_0 : i32, i32
  }
  func.func @transform_7(%arg0: i32) -> (i32, i32) {
    %c0_i32 = arith.constant 0 : i32
    %c0_i32_0 = arith.constant 0 : i32
    %c0_i32_1 = arith.constant 0 : i32
    return %c0_i32, %c0_i32_0 : i32, i32
  }
  func.func @transform_8(%arg0: i32) -> (i32, i32, i32) {
    %c0_i32 = arith.constant 0 : i32
    %c0_i32_0 = arith.constant 0 : i32
    %c0_i32_1 = arith.constant 0 : i32
    return %arg0, %c0_i32, %c0_i32_0 : i32, i32, i32
  }
}

</mosaic_0001>

<bundles_post_ra>
// kernel: _bert_pair_logits.6
= control target key start
LH: loop header
LB: loop body
LE: loop exit
PB: predicated region body
PF: predicated region fallthrough
CT: control target
= control target key end

     0   :  { %s314_s12 = smov 0   ;;  %s347_s0 = inlined_call_operand.vmem [shape: f32[16,32], index: 0, kind: input, shape index: {}]   ;;  %s348_s1 = inlined_call_operand.vmem [shape: f32[1,32], index: 1, kind: input, shape index: {}]   ;;  %s349_s2 = inlined_call_operand.vmem [shape: f32[1,32], index: 2, kind: input, shape index: {}]   ;;  %s350_s3 = inlined_call_operand.vmem [shape: f32[16,32], index: 3, kind: output, shape index: {}]  }
   0x1 LB: > { %s261_s13 = sadd.s32 4294967295, %s291_s12   ;;  %p265_p0 = scmp.ge.s32.totalorder %s291_s12, 1  ;;  %s291_s12 = sphi %s314_s12, %s13_s12  }
   0x2   : > { %p136_p1 = scmp.lt.s32.totalorder %s291_s12, 3 }
   0x4   : > { %p137_p2 = pnand %p265_p0, %p136_p1 }
   0x5   : > { %p158_p3 = scmp.lt.s32.totalorder (!%p137_p2), %s261_s13, 1 }
   0x6   : > { %140 = sbr.rel (%p137_p2) target bundleno = 284 (0x11c), region = 32 }
   0xb   : > { %s352_s13 = smov (!%p158_p3, %s261_s13), 1  ;;  %vm169_vm0 = vcmask 261120   ;;  %v293_v2 = vmov 32.0   ;;  %v279_v23 = vld [vmem:[%s348_s1] ss:$0 sm:$0xff] }
   0xc   : > { %s266_s14 = sshll.u32 %s352_s13, 3  ;;  %281 = vrcp.f32 %v293_v2  ;;  %v280_v25 = vld [vmem:[%s349_s2] ss:$0 sm:$0xff] }
   0xd   : > { %s161_s17 = scalar_lea.vmem %s347_s0, %s266_s14  ;;  %s165_s24 = scalar_lea.vmem %s350_s3, %s266_s14 }
   0xe   : > { %v166_v0 = vld [vmem:[%s161_s17] sm:$0xff] }
   0xf   : > { %v170_v1 = vsel %vm169_vm0, %v166_v0, 0.0 }
  0x10   : > { %171 = vadd.xlane.f32.xlu0 %v170_v1 }
  0x12   : > { %v282_v3 = vpop.eup %281 }
  0x13   : > { %v174_v4 = vmul.f32 32.0, %v282_v3  ;;  %vm178_vm1 = vweird.f32 %v282_v3 }
  0x15   : > { %v175_v5 = vsub.f32 1.0, %v174_v4 }
  0x17   : > { %v176_v6 = vmul.f32 %v282_v3, %v175_v5 }
  0x19   : > { %v177_v7 = vadd.f32 %v282_v3, %v176_v6 }
  0x1b   : > { %v179_v8 = vsel %vm178_vm1, %v282_v3, %v177_v7 }
  0x83   : > { %v172_v9 = vpop.xlane.xlu0 %171 }
  0x84   : > { %v180_v10 = vmul.f32 %v179_v8, %v172_v9 }
  0x86   : > { %v181_v11 = vsub.f32 %v166_v0, %v180_v10 }
  0x88   : > { %v182_v12 = vmul.f32 %v181_v11, %v181_v11 }
  0x8a   : > { %v183_v13 = vsel %vm169_vm0, %v182_v12, 0.0 }
  0x8b   : > { %184 = vadd.xlane.f32.xlu0 %v183_v13 }
  0xfe   : > { %v185_v14 = vpop.xlane.xlu0 %184 }
  0xff   : > { %v186_v15 = vmul.f32 %v185_v14, %v179_v8 }
 0x101   : > { %v187_v16 = vadd.f32 1e-12, %v186_v15 }
 0x103   : > { %283 = vrsqrt.f32 %v187_v16  ;;  %vm194_vm3 = vweird.f32 %v187_v16 }
 0x109   : > { %v284_v17 = vpop.eup %283 }
 0x10a   : > { %v189_v18 = vmul.f32 %v284_v17, %v187_v16  ;;  %vm195_vm2 = vweird.f32 %v284_v17 }
 0x10b   : > { %vm196_vm4 = vmor %vm194_vm3, %vm195_vm2 }
 0x10c   : > { %v190_v19 = vmul.f32 %v284_v17, %v189_v18 }
 0x10e   : > { %v191_v20 = vmul.f32 0.5, %v190_v19 }
 0x110   : > { %v192_v21 = vsub.f32 1.5, %v191_v20 }
 0x112   : > { %v193_v22 = vmul.f32 %v284_v17, %v192_v21 }
 0x114   : > { %v197_v24 = vsel %vm196_vm4, %v284_v17, %v193_v22 }
 0x115   : > { %v198_v26 = vmul.f32 %v197_v24, %v181_v11 }
 0x117   : > { %v202_v27 = vmul.f32 %v279_v23, %v198_v26 }
 0x119   : > { %v206_v28 = vadd.f32 %v280_v25, %v202_v27 }
 0x11b   : > { %207 = vst.msk [vmem:[%s165_s24] sm:$0xff] %vm169_vm0, %v206_v28 }
 0x11c PF: > { %s13_s12 = sadd.s32 1, %s291_s12  }
 0x11d   : > { %p10_p4 = scmp.ge.s32.totalorder %s13_s12, 4  }
 0x11f   :  { %12 = sbr.rel (!%p10_p4) target bundleno = 1 (0x1), region = 62 }

// kernel: _bert_pair_logits.11
= control target key start
LH: loop header
LB: loop body
LE: loop exit
PB: predicated region body
PF: predicated region fallthrough
CT: control target
= control target key end

     0   :  { %12 = vsyncpa [#allocation3], 0  ;;  %s782_s0 = inlined_call_operand.vmem [shape: f32[16,32], index: 0, kind: input, shape index: {}]   ;;  %s783_s1 = inlined_call_operand.vmem [shape: f32[32,32], index: 1, kind: input, shape index: {}]   ;;  %s784_s2 = inlined_call_operand.vmem [shape: f32[1,32], index: 2, kind: input, shape index: {}]   ;;  %s785_s3 = inlined_call_operand.vmem [shape: f32[1,32], index: 3, kind: input, shape index: {}]   ;;  %s786_s4 = inlined_call_operand.vmem [shape: f32[1,32], index: 4, kind: input, shape index: {}]   ;;  %s787_s5 = inlined_call_operand.vmem [shape: f32[64,32], index: 5, kind: input, shape index: {}]   ;;  %s788_s6 = inlined_call_operand.vmem [shape: f32[1,64], index: 6, kind: input, shape index: {}]   ;;  %s789_s7 = inlined_call_operand.hbm [shape: f32[16,64], index: 7, kind: output, shape index: {}]  }
   0x1   :  { %14 = vsyncpa [#allocation3 + $0x1], 0  ;;  %s641_s24 = smov 0   ;;  %s643_s25 = smov 0  }
   0x2   :  { %s645_s26 = smov 0   ;;  %s647_s27 = smov 0  }
   0x3 LB: > { %s662_s28 = sadd.s32 4294967295, %s598_s27   ;;  %s474_s29 = sadd.s32 4294967294, %s598_s27   ;;  %s598_s27 = sphi %s647_s27, %s795_s27   ;;  %s594_s26 = sphi %s645_s26, %s794_s26   ;;  %s590_s25 = sphi %s643_s25, %s793_s25   ;;  %s586_s24 = sphi %s641_s24, %s792_s24  }
   0x4   : > { %s666_s30 = sadd.s32 1, %s598_s27   ;;  %s179_s8 = sadd.s32 1, %s594_s26 }
   0x5   : > { %s176_s9 = ssub.s32 %s598_s27, %s666_s30  ;;  %p189_p0 = scmp.ne.s32.totalorder %s594_s26, %s590_s25 }
   0x6   : > { %p177_p1 = scmp.eq.s32.totalorder %s176_s9, 0  ;;  %p190_p2 = scmp.eq.s32.totalorder %s662_s28, 1 }
   0x7   : > { %p195_p3 = scmp.ne.s32.totalorder %s590_s25, %s586_s24  ;;  %p196_p4 = scmp.eq.s32.totalorder %s474_s29, 1 }
   0x8   : > { %s677_s10 = scalar_select %p177_p1, %s594_s26, %s179_s8  }
   0x9   : > { %p679_p5 = por %p190_p2, %p189_p0  ;;  %p683_p6 = por %p196_p4, %p195_p3 }
   0xa   : > { %p477_p7 = scmp.ge.s32.totalorder %s598_s27, 1  ;;  %p239_p8 = scmp.lt.s32.totalorder %s598_s27, 3 }
   0xc   : > { %p240_p9 = pnand %p477_p7, %p239_p8 }
   0xd   : > { %p270_p10 = scmp.lt.s32.totalorder (!%p240_p9), %s662_s28, 1  ;;  %s267_s20 = sand.u32 (!%p240_p9), 1, %s590_s25  }
   0xe   : > { %243 = sbr.rel (%p240_p9) target bundleno = 582 (0x246), region = 48 }
  0x13   : > { %v278_v0 = vld [vmem:[%s783_s1 + $0x10] sm:$0xff]  ;;  %v279_v1 = vld [vmem:[%s783_s1 + $0x18] sm:$0xff]  ;;  %v276_v2 = vld [vmem:[%s783_s1] sm:$0xff]  ;;  %s271_s21 = scalar_select %p270_p10, %s662_s28, 1  ;;  %vm287_vm0 = vcmask 261120   ;;  %v600_v22 = vmov 32.0  }
  0x14   : > { %v282_v3 = vpack.c.bf16 %v279_v1, %v278_v0  ;;  %v277_v4 = vld [vmem:[%s783_s1 + $0x8] sm:$0xff]  ;;  %v526_v8 = vld [vmem:[%s784_s2] ss:$0 sm:$0xff]  ;;  %v358_v23 = vld [vmem:[%s787_s5 + $0x30] sm:$0xff]  ;;  %vm397_vm5 = vcmask 523264  }
  0x15   : > { %v281_v5 = vpack.c.bf16 %v277_v4, %v276_v2  ;;  %s479_s22 = sshll.u32 %s271_s21, 3  ;;  %v359_v24 = vld [vmem:[%s787_s5 + $0x38] sm:$0xff]  ;;  %v356_v38 = vld [vmem:[%s787_s5 + $0x20] sm:$0xff]  ;;  %v357_v39 = vld [vmem:[%s787_s5 + $0x28] sm:$0xff]  ;;  %s483_s21 = sshll.u32 %s662_s28, 3 }
  0x16   : > { %297 = vmatpush.bf16.msra.mxu0 %v282_v3  ;;  %s273_s8 = scalar_lea.vmem %s782_s0, %s479_s22  ;;  %v364_v25 = vpack.c.bf16 %v359_v24, %v358_v23  ;;  %v363_v40 = vpack.c.bf16 %v357_v39, %v356_v38  ;;  %v354_v42 = vld [vmem:[%s787_s5 + $0x10] sm:$0xff]  ;;  %v355_v43 = vld [vmem:[%s787_s5 + $0x18] sm:$0xff]  ;;  %v352_v46 = vld [vmem:[%s787_s5] sm:$0xff]  ;;  %s478_s22 = sshll.u32 %s267_s20, 3 }
  0x17   : > { %v275_v6 = vld [vmem:[%s273_s8] sm:$0xff]  ;;  %v362_v44 = vpack.c.bf16 %v355_v43, %v354_v42  ;;  %v353_v47 = vld [vmem:[%s787_s5 + $0x8] sm:$0xff]  ;;  %s410_s8 = scalar_lea.hbm %s789_s7, %s483_s21  ;;  %s269_s14 = scalar_lea.vmem [#allocation2], %s478_s22 }
  0x18   : > { %v280_v7 = vpack.c.bf16 %v275_v6, %v275_v6  ;;  %v382_v27 = vsel %vm287_vm0, %v364_v25, 0  ;;  %v379_v41 = vsel %vm287_vm0, %v363_v40, 0  ;;  %v361_v48 = vpack.c.bf16 %v353_v47, %v352_v46  ;;  %v527_v59 = vld [vmem:[%s785_s3] ss:$0 sm:$0xff]  ;;  %s412_s15 = sshll.u32 %s269_s14, 4  ;;  %s414_s16 = sshll.u32 %s410_s8, 4  ;;  %s413_s15 = int_to_ptr.vmem [resolvable:$true] %s412_s15  ;;  %s415_s16 = int_to_ptr.hbm [resolvable:$true] %s414_s16 }
  0x19   : > { %388 = vmatpush.bf16.xpose.msra.mxu1 %v382_v27  ;;  %v376_v45 = vsel %vm287_vm0, %v362_v44, 0  ;;  %v528_v62 = vld [vmem:[%s786_s4] ss:$0 sm:$0xff]  ;;  %s400_s28 = scalar_lea.sflag [#allocation3], %s267_s20  ;;  %s550_s17 = sshra.s32 %s415_s16, 4  ;;  %s551_s17 = int_to_ptr.hbm [resolvable:$true] %s550_s17 }
  0x1a   : > { %298 = vmatpush.bf16.msra.mxu0 %v281_v5  ;;  %v373_v49 = vsel %vm287_vm0, %v361_v48, 0  ;;  %v529_v2 = vld [vmem:[%s788_s6] ss:$0 sm:$0xff]  ;;  %s552_s18 = scalar_lea.hbm %s551_s17, 8  ;;  %s556_s22 = scalar_lea.hbm %s789_s7, 16 }
  0x1b   : > { %p553_p11 = scmp.ne.s32.totalorder %s551_s17, %s552_s18  ;;  %p557_p0 = scmp.lt.s32.totalorder %s551_s17, %s789_s7 }
  0x1c   : > { %p558_p1 = scmp.lt.s32.totalorder %s556_s22, %s552_s18 }
  0x1d   : > { %480 = vmatmul.msk.bf16.vlgmr.msra.gmra.mxu0 %vm287_vm0, %v280_v7  ;;  %p554_p12 = pnand %p553_p11, %p679_p5 }
  0x1e   : > { %p559_p2 = por %p558_p1, %p557_p0 }
  0x1f   : > { %p555_p13 = pneg %p554_p12 }
  0x21   : > { %389 = vmatpush.bf16.xpose.msra.mxu1 %v379_v41  ;;  %p560_p3 = pnand %p559_p2, %p555_p13 }
  0x29   : > { %390 = vmatpush.bf16.xpose.msra.mxu1 %v376_v45 }
  0x31   : > { %391 = vmatpush.bf16.xpose.msra.mxu1 %v373_v49 }
  0x9a   : > { %v300_v9 = vpop.f32.mrf.mxu0 }
  0x9b   : > { %v301_v10 = vadd.f32 %v526_v8, %v300_v9 }
  0x9d   : > { %v305_v11 = vmul.f32 0.044715, %v301_v10  ;;  %v304_v18 = vmul.f32 0.5, %v301_v10 }
  0x9f   : > { %v306_v12 = vmul.f32 %v305_v11, %v301_v10 }
  0xa1   : > { %v307_v13 = vmul.f32 %v306_v12, %v301_v10 }
  0xa2   : > { %v302_v14 = vpop.f32.mrf.mxu0 }
  0xa3   : > { %v308_v15 = vadd.f32 %v307_v13, %v301_v10 }
  0xa5   : > { %v309_v16 = vmul.f32 0.7978846, %v308_v15 }
  0xa7   : > { %530 = vtanh.f32 %v309_v16 }
  0xa8   : > { %532 = vrcp.f32 %v600_v22 }
  0xad   : > { %v531_v17 = vpop.eup %530 }
  0xae   : > { %v311_v19 = vadd.f32 1.0, %v531_v17  ;;  %v533_v26 = vpop.eup %532 }
  0xaf   : > { %v319_v28 = vmul.f32 32.0, %v533_v26  ;;  %vm323_vm1 = vweird.f32 %v533_v26 }
  0xb0   : > { %v312_v20 = vmul.f32 %v311_v19, %v304_v18 }
  0xb1   : > { %v320_v29 = vsub.f32 1.0, %v319_v28 }
  0xb2   : > { %v315_v21 = vsel %vm287_vm0, %v312_v20, 0.0 }
  0xb3   : > { %316 = vadd.xlane.f32.xlu0 %v315_v21  ;;  %v321_v30 = vmul.f32 %v533_v26, %v320_v29 }
  0xb5   : > { %v322_v31 = vadd.f32 %v533_v26, %v321_v30 }
  0xb7   : > { %v324_v32 = vsel %vm323_vm1, %v533_v26, %v322_v31 }
 0x126   : > { %v317_v33 = vpop.xlane.xlu0 %316 }
 0x127   : > { %v325_v34 = vmul.f32 %v324_v32, %v317_v33 }
 0x129   : > { %v326_v35 = vsub.f32 %v312_v20, %v325_v34 }
 0x12b   : > { %v327_v36 = vmul.f32 %v326_v35, %v326_v35 }
 0x12d   : > { %v328_v37 = vsel %vm287_vm0, %v327_v36, 0.0 }
 0x12e   : > { %329 = vadd.xlane.f32.xlu0 %v328_v37 }
 0x1a1   : > { %v330_v50 = vpop.xlane.xlu0 %329 }
 0x1a2   : > { %v331_v51 = vmul.f32 %v330_v50, %v324_v32 }
 0x1a4   : > { %v332_v52 = vadd.f32 1e-12, %v331_v51 }
 0x1a6   : > { %534 = vrsqrt.f32 %v332_v52  ;;  %vm339_vm3 = vweird.f32 %v332_v52 }
 0x1ac   : > { %v535_v53 = vpop.eup %534 }
 0x1ad   : > { %v334_v54 = vmul.f32 %v535_v53, %v332_v52  ;;  %vm340_vm2 = vweird.f32 %v535_v53 }
 0x1ae   : > { %vm341_vm4 = vmor %vm339_vm3, %vm340_vm2 }
 0x1af   : > { %v335_v55 = vmul.f32 %v535_v53, %v334_v54 }
 0x1b1   : > { %v336_v56 = vmul.f32 0.5, %v335_v55 }
 0x1b3   : > { %v337_v57 = vsub.f32 1.5, %v336_v56 }
 0x1b5   : > { %v338_v58 = vmul.f32 %v535_v53, %v337_v57 }
 0x1b7   : > { %v342_v60 = vsel %vm341_vm4, %v535_v53, %v338_v58 }
 0x1b8   : > { %v343_v61 = vmul.f32 %v342_v60, %v326_v35 }
 0x1ba   : > { %v347_v63 = vmul.f32 %v527_v59, %v343_v61 }
 0x1bc   : > { %v351_v0 = vadd.f32 %v528_v62, %v347_v63 }
 0x1be   : > { %v360_v1 = vpack.c.bf16 %v351_v0, %v351_v0 }
 0x1c0   : > { %481 = vmatmul.msk.bf16.vlgmr.msra.gmra.mxu1 %vm287_vm0, %v360_v1 }
 0x23d   : > { %v393_v3 = vpop.f32.mrf.mxu1 }
 0x23e   : > { %v394_v4 = vadd.f32 %v529_v2, %v393_v3 }
 0x240   : > { %398 = vst.msk [vmem:[%s269_s14] sm:$0xff] %vm397_vm5, %v394_v4 }
 0x241   : > { %563 = shalt.err (!%p560_p3)
}
 0x242   : > { %486 = dma.vmem_to_hbm [thread:$0]  (%p679_p5), %s413_s15, 128, %s415_s16, %s400_s28  }
 0x245   : > { %v395_v5 = vpop.f32.mrf.mxu1 }
 0x246 PF: > { %p492_p4 = scmp.ge.s32.totalorder %s598_s27, 2  ;;  %s426_s20 = sand.u32 1, %s586_s24  }
 0x247   : > { %s427_s8 = scalar_lea.sflag [#allocation3], %s426_s20 }
 0x248   : > { %p489_p7 = pnand %p492_p4, %p683_p6 }
 0x24a   : > { %p490_p8 = pneg %p489_p7 }
 0x24c   : > { %581 = dma.done.wait (%p490_p8), %s427_s8, 128  }
 0x24d   : > { %583 = vsyncadd (%p490_p8), %s427_s8, 4294967168  ;;  %p17_p9 = scmp.ge.s32.totalorder %s666_s30, 4   ;;  %s792_s24 = smov %s590_s25 }
 0x24e   : > { %s793_s25 = smov %s594_s26  ;;  %s794_s26 = smov %s677_s10 }
 0x24f   : > { %s795_s27 = smov %s666_s30  ;;  %19 = sbr.rel (!%p17_p9) target bundleno = 3 (0x3), region = 83 }
 0x254   :  { %433 = vsyncpa [#allocation3], 1 }
 0x255   :  { %435 = vsyncpa [#allocation3 + $0x1], 1 }

// kernel: _bert_pair_logits.8
= control target key start
LH: loop header
LB: loop body
LE: loop exit
PB: predicated region body
PF: predicated region fallthrough
CT: control target
= control target key end

     0   :  { %s520_s24 = smov 0   ;;  %s596_s0 = inlined_call_operand.vmem [shape: f32[16,32], index: 0, kind: input, shape index: {}]   ;;  %s597_s1 = inlined_call_operand.vmem [shape: f32[32,64], index: 1, kind: input, shape index: {}]   ;;  %s598_s2 = inlined_call_operand.vmem [shape: f32[1,64], index: 2, kind: input, shape index: {}]   ;;  %s599_s3 = inlined_call_operand.vmem [shape: f32[64,32], index: 3, kind: input, shape index: {}]   ;;  %s600_s4 = inlined_call_operand.vmem [shape: f32[1,32], index: 4, kind: input, shape index: {}]   ;;  %s601_s5 = inlined_call_operand.vmem [shape: f32[1,32], index: 5, kind: input, shape index: {}]   ;;  %s602_s6 = inlined_call_operand.vmem [shape: f32[1,32], index: 6, kind: input, shape index: {}]   ;;  %s603_s7 = inlined_call_operand.vmem [shape: f32[16,32], index: 7, kind: output, shape index: {}]  }
   0x1 LB: > { %s441_s25 = sadd.s32 4294967295, %s477_s24   ;;  %p445_p0 = scmp.ge.s32.totalorder %s477_s24, 1  ;;  %s477_s24 = sphi %s520_s24, %s17_s24  }
   0x2   : > { %p236_p1 = scmp.lt.s32.totalorder %s477_s24, 3 }
   0x4   : > { %p237_p2 = pnand %p445_p0, %p236_p1 }
   0x5   : > { %p266_p3 = scmp.lt.s32.totalorder (!%p237_p2), %s441_s25, 1 }
   0x6   : > { %240 = sbr.rel (%p237_p2) target bundleno = 571 (0x23b), region = 48 }
   0xb   : > { %v278_v0 = vld [vmem:[%s597_s1 + $0x10] sm:$0xff]  ;;  %v279_v1 = vld [vmem:[%s597_s1 + $0x18] sm:$0xff]  ;;  %v276_v2 = vld [vmem:[%s597_s1] sm:$0xff]  ;;  %s605_s25 = smov (!%p266_p3, %s441_s25), 1  ;;  %vm287_vm0 = vcmask 261120   ;;  %vm330_vm1 = vcmask 523264  }
   0xc   : > { %v282_v3 = vpack.c.bf16 %v279_v1, %v278_v0  ;;  %v277_v4 = vld [vmem:[%s597_s1 + $0x8] sm:$0xff]  ;;  %s446_s11 = sshll.u32 %s605_s25, 3  ;;  %v319_v8 = vld [vmem:[%s599_s3 + $0x30] sm:$0xff]  ;;  %v320_v9 = vld [vmem:[%s599_s3 + $0x38] sm:$0xff]  ;;  %v479_v40 = vmov 32.0  }
   0xd   : > { %v281_v5 = vpack.c.bf16 %v277_v4, %v276_v2  ;;  %s269_s14 = scalar_lea.vmem %s596_s0, %s446_s11  ;;  %v317_v10 = vld [vmem:[%s599_s3 + $0x20] sm:$0xff]  ;;  %v325_v11 = vpack.c.bf16 %v320_v9, %v319_v8  ;;  %v318_v12 = vld [vmem:[%s599_s3 + $0x28] sm:$0xff]  ;;  %v315_v14 = vld [vmem:[%s599_s3 + $0x10] sm:$0xff]  ;;  %s273_s21 = scalar_lea.vmem %s603_s7, %s446_s11 }
   0xe   : > { %297 = vmatpush.bf16.msra.mxu0 %v282_v3  ;;  %v275_v6 = vld [vmem:[%s269_s14] sm:$0xff]  ;;  %v324_v13 = vpack.c.bf16 %v318_v12, %v317_v10  ;;  %v316_v15 = vld [vmem:[%s599_s3 + $0x18] sm:$0xff]  ;;  %v314_v18 = vld [vmem:[%s599_s3 + $0x8] sm:$0xff] }
   0xf   : > { %v280_v7 = vpack.c.bf16 %v275_v6, %v275_v6  ;;  %338 = vmatpush.bf16.msra.mxu1 %v325_v11  ;;  %v323_v16 = vpack.c.bf16 %v316_v15, %v315_v14  ;;  %v313_v17 = vld [vmem:[%s599_s3] sm:$0xff] }
  0x10   : > { %v322_v19 = vpack.c.bf16 %v314_v18, %v313_v17  ;;  %v461_v20 = vld [vmem:[%s598_s2] ss:$0 sm:$0xff] }
  0x11   : > { %v462_v34 = vld [vmem:[%s600_s4] ss:$0 sm:$0xff] }
  0x12   : > { %298 = vmatpush.bf16.msra.mxu0 %v281_v5  ;;  %v463_v61 = vld [vmem:[%s601_s5] ss:$0 sm:$0xff] }
  0x13   : > { %339 = vmatpush.bf16.msra.mxu1 %v324_v13  ;;  %v464_v63 = vld [vmem:[%s602_s6] ss:$0 sm:$0xff] }
  0x15   : > { %448 = vmatmul.msk.bf16.vlgmr.msra.gmra.mxu0 %vm287_vm0, %v280_v7 }
  0x17   : > { %340 = vmatpush.bf16.msra.mxu1 %v323_v16 }
  0x1b   : > { %341 = vmatpush.bf16.msra.mxu1 %v322_v19 }
  0x92   : > { %v300_v21 = vpop.f32.mrf.mxu0 }
  0x93   : > { %v301_v22 = vadd.f32 %v461_v20, %v300_v21 }
  0x95   : > { %v305_v23 = vmul.f32 0.044715, %v301_v22  ;;  %v304_v30 = vmul.f32 0.5, %v301_v22 }
  0x97   : > { %v306_v24 = vmul.f32 %v305_v23, %v301_v22 }
  0x99   : > { %v307_v25 = vmul.f32 %v306_v24, %v301_v22 }
  0x9a   : > { %v302_v26 = vpop.f32.mrf.mxu0 }
  0x9b   : > { %v308_v27 = vadd.f32 %v307_v25, %v301_v22 }
  0x9d   : > { %v309_v28 = vmul.f32 0.7978846, %v308_v27 }
  0x9f   : > { %465 = vtanh.f32 %v309_v28 }
  0xa0   : > { %467 = vrcp.f32 %v479_v40 }
  0xa5   : > { %v466_v29 = vpop.eup %465 }
  0xa6   : > { %v311_v31 = vadd.f32 1.0, %v466_v29  ;;  %v468_v41 = vpop.eup %467 }
  0xa7   : > { %v354_v42 = vmul.f32 32.0, %v468_v41  ;;  %vm358_vm2 = vweird.f32 %v468_v41 }
  0xa8   : > { %v312_v32 = vmul.f32 %v311_v31, %v304_v30 }
  0xa9   : > { %v355_v43 = vsub.f32 1.0, %v354_v42 }
  0xaa   : > { %v321_v33 = vpack.c.bf16 %v312_v32, %v312_v32 }
  0xab   : > { %v356_v44 = vmul.f32 %v468_v41, %v355_v43 }
  0xac   : > { %449 = vmatmul.msk.bf16.vlgmr.msra.gmra.mxu1 %vm330_vm1, %v321_v33 }
  0xad   : > { %v357_v45 = vadd.f32 %v468_v41, %v356_v44 }
  0xaf   : > { %v359_v46 = vsel %vm358_vm2, %v468_v41, %v357_v45 }
 0x129   : > { %v343_v35 = vpop.f32.mrf.mxu1 }
 0x12a   : > { %v344_v36 = vadd.f32 %v462_v34, %v343_v35 }
 0x12c   : > { %v347_v37 = vadd.f32 %v344_v36, %v275_v6 }
 0x12e   : > { %v350_v38 = vsel %vm287_vm0, %v347_v37, 0.0 }
 0x12f   : > { %351 = vadd.xlane.f32.xlu0 %v350_v38 }
 0x131   : > { %v345_v39 = vpop.f32.mrf.mxu1 }
 0x1a2   : > { %v352_v47 = vpop.xlane.xlu0 %351 }
 0x1a3   : > { %v360_v48 = vmul.f32 %v359_v46, %v352_v47 }
 0x1a5   : > { %v361_v49 = vsub.f32 %v347_v37, %v360_v48 }
 0x1a7   : > { %v362_v50 = vmul.f32 %v361_v49, %v361_v49 }
 0x1a9   : > { %v363_v51 = vsel %vm287_vm0, %v362_v50, 0.0 }
 0x1aa   : > { %364 = vadd.xlane.f32.xlu0 %v363_v51 }
 0x21d   : > { %v365_v52 = vpop.xlane.xlu0 %364 }
 0x21e   : > { %v366_v53 = vmul.f32 %v365_v52, %v359_v46 }
 0x220   : > { %v367_v54 = vadd.f32 1e-12, %v366_v53 }
 0x222   : > { %469 = vrsqrt.f32 %v367_v54  ;;  %vm374_vm4 = vweird.f32 %v367_v54 }
 0x228   : > { %v470_v55 = vpop.eup %469 }
 0x229   : > { %v369_v56 = vmul.f32 %v470_v55, %v367_v54  ;;  %vm375_vm3 = vweird.f32 %v470_v55 }
 0x22a   : > { %vm376_vm5 = vmor %vm374_vm4, %vm375_vm3 }
 0x22b   : > { %v370_v57 = vmul.f32 %v470_v55, %v369_v56 }
 0x22d   : > { %v371_v58 = vmul.f32 0.5, %v370_v57 }
 0x22f   : > { %v372_v59 = vsub.f32 1.5, %v371_v58 }
 0x231   : > { %v373_v60 = vmul.f32 %v470_v55, %v372_v59 }
 0x233   : > { %v377_v62 = vsel %vm376_vm5, %v470_v55, %v373_v60 }
 0x234   : > { %v378_v0 = vmul.f32 %v377_v62, %v361_v49 }
 0x236   : > { %v382_v1 = vmul.f32 %v463_v61, %v378_v0 }
 0x238   : > { %v386_v2 = vadd.f32 %v464_v63, %v382_v1 }
 0x23a   : > { %387 = vst.msk [vmem:[%s273_s21] sm:$0xff] %vm287_vm0, %v386_v2 }
 0x23b PF: > { %s17_s24 = sadd.s32 1, %s477_s24  }
 0x23c   : > { %p14_p4 = scmp.ge.s32.totalorder %s17_s24, 4  }
 0x23e   :  { %16 = sbr.rel (!%p14_p4) target bundleno = 1 (0x1), region = 78 }

// kernel: _bert_pair_logits.7
= control target key start
LH: loop header
LB: loop body
LE: loop exit
PB: predicated region body
PF: predicated region fallthrough
CT: control target
= control target key end

     0   :  { %s722_s27 = smov 0   ;;  %s807_s0 = inlined_call_operand.vmem [shape: f32[2,8,32], index: 0, kind: input, shape index: {}]   ;;  %s808_s1 = inlined_call_operand.vmem [shape: f32[2,1,8], index: 1, kind: input, shape index: {}]   ;;  %s809_s2 = inlined_call_operand.vmem [shape: f32[32,96], index: 2, kind: input, shape index: {}]   ;;  %s810_s3 = inlined_call_operand.vmem [shape: f32[1,96], index: 3, kind: input, shape index: {}]   ;;  %s811_s4 = inlined_call_operand.vmem [shape: f32[32,32], index: 4, kind: input, shape index: {}]   ;;  %s812_s5 = inlined_call_operand.vmem [shape: f32[1,32], index: 5, kind: input, shape index: {}]   ;;  %s813_s6 = inlined_call_operand.vmem [shape: f32[1,32], index: 6, kind: input, shape index: {}]   ;;  %s814_s7 = inlined_call_operand.vmem [shape: f32[1,32], index: 7, kind: input, shape index: {}]   ;;  %s815_s8 = inlined_call_operand.vmem [shape: f32[2,8,32], index: 8, kind: output, shape index: {}]  }
   0x1 LB: > { %s616_s28 = sadd.s32 4294967295, %s669_s27   ;;  %p620_p0 = scmp.ge.s32.totalorder %s669_s27, 1  ;;  %s669_s27 = sphi %s722_s27, %s18_s27  }
   0x2   : > { %p269_p1 = scmp.lt.s32.totalorder %s669_s27, 3 }
   0x4   : > { %p270_p2 = pnand %p620_p0, %p269_p1 }
   0x5   : > { %p304_p3 = scmp.lt.s32.totalorder (!%p270_p2), %s616_s28, 1  ;;  %s671_s21 = smov (!%p270_p2), 112  }
   0x6   : > { %273 = sbr.rel (%p270_p2) target bundleno = 1211 (0x4bb), region = 52  ;;  %s672_s22 = smov (!%p270_p2), 96  }
   0x7   : > { %s673_s23 = smov (!%p270_p2), 80   ;;  %s674_s24 = smov (!%p270_p2), 64  }
   0x8   : > { %s675_s25 = smov (!%p270_p2), 48  }
   0xb   : > { %v320_v0 = vld [vmem:[%s809_s2 + $0x10] sm:$0xff]  ;;  %v321_v1 = vld [vmem:[%s809_s2 + $0x18] sm:$0xff]  ;;  %v318_v2 = vld [vmem:[%s809_s2] sm:$0xff]  ;;  %s817_s28 = smov (!%p304_p3, %s616_s28), 1  ;;  %vm329_vm0 = vcmask 261120   ;;  %vm354_vm1 = vcmask 130048  }
   0xc   : > { %v324_v3 = vpack.c.bf16 %v321_v1, %v320_v0  ;;  %v319_v4 = vld [vmem:[%s809_s2 + $0x8] sm:$0xff]  ;;  %s621_s15 = sshll.u32 %s817_s28, 3  ;;  %v646_v8 = vld [vmem:[%s810_s3] ss:$0 sm:$0xff]  ;;  %s310_s30 = scalar_lea.vmem %s808_s1, %s817_s28  ;;  %vm397_vm2 = vcmask 1043456   ;;  %vm379_vm3 = vcmask 64512  }
   0xd   : > { %v323_v5 = vpack.c.bf16 %v319_v4, %v318_v2  ;;  %s307_s18 = scalar_lea.vmem %s807_s0, %s621_s15  ;;  %v647_v22 = vld [vmem:[%s310_s30] ss:$0 sm:$0xff]  ;;  %v347_v52 = vld [vmem:[%s811_s4 + $0x8] sm:$0xff]  ;;  %v348_v54 = vld [vmem:[%s811_s4 + $0x10] sm:$0xff]  ;;  %s314_s26 = scalar_lea.vmem %s815_s8, %s621_s15 }
   0xe   : > { %339 = vmatpush.bf16.msra.mxu0 %v324_v3  ;;  %v750_v6 = vld [vmem:[%s307_s18] sm:$0xff]  ;;  %v349_v55 = vld [vmem:[%s811_s4 + $0x18] sm:$0xff] }
   0xf   : > { %v322_v7 = vpack.c.bf16 %v750_v6, %v750_v6  ;;  %v346_v51 = vld [vmem:[%s811_s4] sm:$0xff]  ;;  %v475_v56 = vpack.c.bf16 %v349_v55, %v348_v54 }
  0x10   : > { %v415_v53 = vpack.c.bf16 %v347_v52, %v346_v51  ;;  %v648_v1 = vld [vmem:[%s812_s5] ss:$0 sm:$0xff] }
  0x12   : > { %340 = vmatpush.bf16.msra.mxu0 %v323_v5 }
  0x15   : > { %623 = vmatmul.msk.bf16.vlgmr.msra.gmra.mxu0 %vm329_vm0, %v322_v7 }
  0x16   : > { %486 = vmatpush.bf16.msrb.mxu0 %v475_v56 }
  0x92   : > { %v342_v9 = vpop.f32.mrf.mxu0 }
  0x93   : > { %v343_v10 = vadd.f32 %v646_v8, %v342_v9  ;;  %v676_v9 = vmov 32.0  }
  0x95   : > { %v350_v11 = vpack.c.bf16 %v343_v10, %v343_v10 }
  0x97   : > { %416 = vrot.lane.b32.xlu1 %v350_v11, %s671_s21  ;;  %352 = vrot.lane.b32.xlu0 %v350_v11, %s672_s22 }
  0x9a   : > { %v344_v12 = vpop.f32.mrf.mxu0 }
  0x9f   : > { %418 = vrot.lane.b32.xlu0 %v350_v11, %s673_s23 }
  0xa7   : > { %392 = vrot.lane.b32.xlu0 %v350_v11, %s674_s24 }
  0xaf   : > { %453 = vrot.lane.b32.xlu0 %v350_v11, %s675_s25 }
 0x109   : > { %v353_v13 = vpop.permute.xlu0 %352  ;;  %v417_v17 = vpop.permute.xlu1 %416 }
 0x10a   : > { %v359_v14 = vsel %vm354_vm1, %v353_v13, 0 }
 0x10b   : > { %368 = vmatpush.bf16.xpose.msra.mxu1 %v359_v14 }
 0x111   : > { %v419_v15 = vpop.permute.xlu0 %418 }
 0x112   : > { %624 = vmatmul.msk.bf16.vlgmr.msra.gmra.mxu1 %vm354_vm1, %v350_v11  ;;  %v424_v16 = vsel %vm354_vm1, %v419_v15, 0 }
 0x113   : > { %433 = vmatpush.bf16.xpose.msra.mxu3 %v424_v16  ;;  %502 = vmatpush.bf16.msrb.mxu1 %v415_v53 }
 0x119   : > { %v393_v18 = vpop.permute.xlu0 %392 }
 0x11a   : > { %626 = vmatmul.msk.bf16.vlgmr.msra.gmra.mxu3 %vm354_vm1, %v417_v17  ;;  %v399_v19 = vsel %vm397_vm2, %v393_v18, 0 }
 0x11b   : > { %408 = vmatpush.bf16.msra.mxu2 %v399_v19 }
 0x121   : > { %v454_v20 = vpop.permute.xlu0 %453 }
 0x122   : > { %v459_v21 = vsel %vm397_vm2, %v454_v20, 0 }
 0x123   : > { %468 = vmatpush.bf16.msrb.mxu2 %v459_v21 }
 0x18f   : > { %v370_v23 = vpop.f32.mrf.mxu1 }
 0x190   : > { %v374_v24 = vmul.f32 0.25, %v370_v23 }
 0x192   : > { %v378_v25 = vadd.f32 %v647_v22, %v374_v24 }
 0x194   : > { %v380_v26 = vsel %vm379_vm3, %v378_v25, -inf }
 0x195   : > { %381 = vmax.xlane.f32.xlu1 %v380_v26 }
 0x197   : > { %v372_v27 = vpop.f32.mrf.mxu1 }
 0x19d   : > { %v435_v28 = vpop.f32.mrf.mxu3 }
 0x19e   : > { %v439_v29 = vmul.f32 0.25, %v435_v28 }
 0x1a0   : > { %v440_v30 = vadd.f32 %v647_v22, %v439_v29  ;;  %v649_v29 = vld [vmem:[%s813_s6] ss:$0 sm:$0xff] }
 0x1a2   : > { %v441_v31 = vsel %vm379_vm3, %v440_v30, -inf }
 0x1a3   : > { %442 = vmax.xlane.f32.xlu2 %v441_v31  ;;  %v650_v31 = vld [vmem:[%s814_s7] ss:$0 sm:$0xff] }
 0x1a5   : > { %v437_v32 = vpop.f32.mrf.mxu3 }
 0x208   : > { %v382_v33 = vpop.xlane.xlu1 %381 }
 0x209   : > { %v383_v34 = vsub.f32 %v378_v25, %v382_v33 }
 0x20b   : > { %v384_v35 = vmul.f32 1.442695, %v383_v34 }
 0x20d   : > { %651 = vpow2.f32 %v384_v35 }
 0x213   : > { %v652_v36 = vpop.eup %651 }
 0x214   : > { %v386_v37 = vsel %vm379_vm3, %v652_v36, 0.0 }
 0x215   : > { %387 = vadd.xlane.f32.xlu2 %v386_v37 }
 0x216   : > { %v443_v38 = vpop.xlane.xlu2 %442 }
 0x217   : > { %v444_v39 = vsub.f32 %v440_v30, %v443_v38 }
 0x219   : > { %v445_v40 = vmul.f32 1.442695, %v444_v39 }
 0x21b   : > { %653 = vpow2.f32 %v445_v40 }
 0x221   : > { %v654_v41 = vpop.eup %653 }
 0x222   : > { %v447_v42 = vsel %vm379_vm3, %v654_v41, 0.0 }
 0x223   : > { %448 = vadd.xlane.f32.xlu2 %v447_v42 }
 0x288   : > { %v388_v43 = vpop.xlane.xlu2 %387 }
 0x289   : > { %655 = vrcp.f32 %v388_v43 }
 0x28f   : > { %v656_v44 = vpop.eup %655 }
 0x290   : > { %v390_v45 = vmul.f32 %v656_v44, %v652_v36 }
 0x292   : > { %v391_v46 = vpack.c.bf16 %v390_v45, %v390_v45 }
 0x294   : > { %625 = vmatmul.msk.bf16.vlgmr.msra.gmra.mxu2 %vm379_vm3, %v391_v46 }
 0x296   : > { %v449_v47 = vpop.xlane.xlu2 %448 }
 0x297   : > { %657 = vrcp.f32 %v449_v47 }
 0x298   : > { %659 = vrcp.f32 %v676_v9 }
 0x29d   : > { %v658_v48 = vpop.eup %657 }
 0x29e   : > { %v451_v49 = vmul.f32 %v658_v48, %v654_v41  ;;  %v660_v10 = vpop.eup %659 }
 0x29f   : > { %v520_v11 = vmul.f32 32.0, %v660_v10  ;;  %vm524_vm4 = vweird.f32 %v660_v10 }
 0x2a0   : > { %v452_v50 = vpack.c.bf16 %v451_v49, %v451_v49 }
 0x2a1   : > { %v521_v12 = vsub.f32 1.0, %v520_v11 }
 0x2a3   : > { %v522_v13 = vmul.f32 %v660_v10, %v521_v12 }
 0x2a4   : > { %627 = vmatmul.msk.bf16.vlgmr.msrb.gmra.mxu2 %vm379_vm3, %v452_v50 }
 0x2a5   : > { %v523_v14 = vadd.f32 %v660_v10, %v522_v13 }
 0x2a7   : > { %v525_v15 = vsel %vm524_vm4, %v660_v10, %v523_v14 }
 0x317   : > { %v410_v57 = vpop.f32.mrf.mxu2 }
 0x318   : > { %v414_v58 = vpack.c.bf16 %v410_v57, %v410_v57 }
 0x31a   : > { %629 = vmatmul.msk.bf16.vlgmr.msrb.gmra.mxu1 %vm354_vm1, %v414_v58 }
 0x31f   : > { %v412_v59 = vpop.f32.mrf.mxu2 }
 0x327   : > { %v470_v60 = vpop.f32.mrf.mxu2 }
 0x328   : > { %v474_v61 = vpack.c.bf16 %v470_v60, %v470_v60 }
 0x32a   : > { %628 = vmatmul.msk.bf16.vlgmr.msrb.gmra.mxu0 %vm354_vm1, %v474_v61 }
 0x32f   : > { %v472_v62 = vpop.f32.mrf.mxu2 }
 0x397   : > { %v504_v63 = vpop.f32.mrf.mxu1 }
 0x39f   : > { %v506_v0 = vpop.f32.mrf.mxu1 }
 0x3a7   : > { %v488_v2 = vpop.f32.mrf.mxu0 }
 0x3a8   : > { %v505_v3 = vadd.f32 %v504_v63, %v488_v2 }
 0x3aa   : > { %v512_v4 = vadd.f32 %v648_v1, %v505_v3 }
 0x3ac   : > { %v513_v5 = vadd.f32 %v512_v4, %v750_v6 }
 0x3ae   : > { %v516_v7 = vsel %vm329_vm0, %v513_v5, 0.0 }
 0x3af   : > { %517 = vadd.xlane.f32.xlu2 %v516_v7  ;;  %v490_v8 = vpop.f32.mrf.mxu0 }
 0x422   : > { %v518_v16 = vpop.xlane.xlu2 %517 }
 0x423   : > { %v526_v17 = vmul.f32 %v525_v15, %v518_v16 }
 0x425   : > { %v527_v18 = vsub.f32 %v513_v5, %v526_v17 }
 0x427   : > { %v528_v19 = vmul.f32 %v527_v18, %v527_v18 }
 0x429   : > { %v529_v20 = vsel %vm329_vm0, %v528_v19, 0.0 }
 0x42a   : > { %530 = vadd.xlane.f32.xlu0 %v529_v20 }
 0x49d   : > { %v531_v6 = vpop.xlane.xlu0 %530 }
 0x49e   : > { %v532_v21 = vmul.f32 %v531_v6, %v525_v15 }
 0x4a0   : > { %v533_v22 = vadd.f32 1e-12, %v532_v21 }
 0x4a2   : > { %661 = vrsqrt.f32 %v533_v22  ;;  %vm540_vm6 = vweird.f32 %v533_v22 }
 0x4a8   : > { %v662_v23 = vpop.eup %661 }
 0x4a9   : > { %v535_v24 = vmul.f32 %v662_v23, %v533_v22  ;;  %vm541_vm5 = vweird.f32 %v662_v23 }
 0x4aa   : > { %vm542_vm7 = vmor %vm540_vm6, %vm541_vm5 }
 0x4ab   : > { %v536_v25 = vmul.f32 %v662_v23, %v535_v24 }
 0x4ad   : > { %v537_v26 = vmul.f32 0.5, %v536_v25 }
 0x4af   : > { %v538_v27 = vsub.f32 1.5, %v537_v26 }
 0x4b1   : > { %v539_v28 = vmul.f32 %v662_v23, %v538_v27 }
 0x4b3   : > { %v543_v30 = vsel %vm542_vm7, %v662_v23, %v539_v28 }
 0x4b4   : > { %v544_v32 = vmul.f32 %v543_v30, %v527_v18 }
 0x4b6   : > { %v548_v33 = vmul.f32 %v649_v29, %v544_v32 }
 0x4b8   : > { %v552_v34 = vadd.f32 %v650_v31, %v548_v33 }
 0x4ba   : > { %553 = vst.msk [vmem:[%s314_s26] sm:$0xff] %vm329_vm0, %v552_v34 }
 0x4bb PF: > { %s18_s27 = sadd.s32 1, %s669_s27  }
 0x4bc   : > { %p15_p4 = scmp.ge.s32.totalorder %s18_s27, 4  }
 0x4be   :  { %17 = sbr.rel (!%p15_p4) target bundleno = 1 (0x1), region = 85 }

</bundles_post_ra>
